<compile_context>
chip_gen: v7x
topology: tpu7x:2x2x1
jax: 0.10.0
libtpu: 0.0.40
codegen_flags: <defaults>
</compile_context>

<pallas_src>
import functools
import math

import jax
import jax.numpy as jnp
import numpy as np
from jax.experimental import pallas as pl
from jax.experimental.pallas import tpu as pltpu

D_MODEL = 32                  # scaled-down d_model (original default 512)
NF = D_MODEL // 4             # filters per Inception branch
KS = (39, 19, 9)              # InceptionModule default kernel sizes (ks=40 -> odd)
K0 = KS[0]
PADMAX = K0 // 2              # 19
KIM = K0 * NF + D_MODEL       # im2col rows: 39 shift-blocks of yb + maxpool(x) rows
LANE = 128                    # lanes per grid step (LANE // L samples side by side)
EPS = 1e-5
NEG = float(np.finfo(np.float32).min)   # MaxPool1d pad value (finite -inf stand-in)


def _inception_encoder_kernel(x_ref, wb_ref, wf_ref, aff_ref, o_ref, col_ref,
                              *, seq_len):
    """One (C, LANE) slab = LANE // seq_len samples packed along lanes."""
    C = x_ref.shape[0]
    x = x_ref[...]                                              # (C, LANE) f32

    # ---- bottleneck 1x1 conv: bf16 MXU matmul, f32 accumulation ----
    yb = jnp.dot(wb_ref[...], x.astype(jnp.bfloat16),
                 preferred_element_type=jnp.float32)            # (NF, LANE) f32

    # Position of each lane inside its sample (seq_len divides LANE, so sample
    # boundaries coincide with lane-block boundaries).
    pos = jax.lax.broadcasted_iota(jnp.int32, (1, LANE), 1) % seq_len

    # ---- im2col: 39 zero-padded-'same' lane shifts of yb (aligned f32 stores) ----
    for t in range(K0):                                         # static unroll
        s = t - PADMAX                                          # shift in [-19, 19]
        rolled = yb if s == 0 else pltpu.roll(yb, shift=(-s) % LANE, axis=1)
        valid = jnp.logical_and(pos + s >= 0, pos + s < seq_len)
        col_ref[pl.ds(t * NF, NF), :] = jnp.where(valid, rolled, 0.0)

    # ---- maxpool(3, stride=1, pad=1) on raw x -> last C rows of the im2col ----
    left = jnp.where(pos >= 1, pltpu.roll(x, shift=1, axis=1), NEG)
    right = jnp.where(pos <= seq_len - 2,
                      pltpu.roll(x, shift=LANE - 1, axis=1), NEG)
    col_ref[pl.ds(K0 * NF, C), :] = jnp.maximum(jnp.maximum(x, left), right)

    # ---- all four Inception branches (+ folded BN1 scale) in ONE MXU matmul ----
    y = jnp.dot(wf_ref[...], col_ref[...].astype(jnp.bfloat16),
                preferred_element_type=jnp.float32)             # (C, LANE) f32
    y = jnp.maximum(y + aff_ref[0], 0.0)                        # + BN1 bias, ReLU

    # ---- residual add (dropout = identity) + folded eval-mode BN2 affine ----
    o_ref[...] = (x + y) * aff_ref[1] + aff_ref[2]


def inception_encoder_layer(x, fused_params):
    """x: (N, C, L) float32 in NCL layout. fused_params from prepare_fused()."""
    wb, wf, aff = fused_params
    N, C, L = x.shape
    assert C == D_MODEL
    assert LANE % L == 0, "sample length must divide the 128-lane block"
    assert (N * L) % LANE == 0, "N*L must be a multiple of 128 (pad the batch)"
    nblk = (N * L) // LANE

    # Layout plumbing in the wrapper: (N, C, L) -> lane-dense (C, N*L) slab.
    xs = jnp.reshape(jnp.transpose(x, (1, 0, 2)), (C, N * L))

    kernel = functools.partial(_inception_encoder_kernel, seq_len=L)
    out = pl.pallas_call(
        kernel,
        out_shape=jax.ShapeDtypeStruct((C, N * L), jnp.float32),
        grid_spec=pltpu.PrefetchScalarGridSpec(
            num_scalar_prefetch=0,
            grid=(nblk,),
            in_specs=[
                pl.BlockSpec((C, LANE), lambda i: (0, i)),      # x slab
                pl.BlockSpec((NF, C), lambda i: (0, 0)),        # bottleneck 1x1 (bf16)
                pl.BlockSpec((C, KIM), lambda i: (0, 0)),       # fused branch W (bf16)
                pl.BlockSpec((3, C, 1), lambda i: (0, 0, 0)),   # [bias1, scale2, shift2]
            ],
            out_specs=pl.BlockSpec((C, LANE), lambda i: (0, i)),
            scratch_shapes=[pltpu.VMEM((KIM, LANE), jnp.float32)],   # im2col
        ),
        compiler_params=pltpu.CompilerParams(
            dimension_semantics=("parallel",)),
    )(xs, wb, wf, aff)

    return jnp.transpose(jnp.reshape(out, (C, N, L)), (1, 0, 2))


def prepare_fused(raw_params):
    """Fold eval-mode BN1 into one block-structured fused weight (bf16) and
    pre-combine BN2 into a per-channel (scale, shift) pair."""
    wb, w0, w1, w2, wmp, bn1, bn2 = raw_params
    C = wb.shape[1]

    g1, be1, m1, v1 = (np.asarray(bn1[i], np.float32) for i in range(4))
    g2, be2, m2, v2 = (np.asarray(bn2[i], np.float32) for i in range(4))
    scale1 = g1 / np.sqrt(v1 + EPS)
    bias1 = be1 - m1 * scale1
    scale2 = g2 / np.sqrt(v2 + EPS)
    shift2 = be2 - m2 * scale2

    # Fused weight: rows = output channels in concat order [b0|b1|b2|maxpool],
    # cols = im2col rows (39 shift-blocks of yb, then the C maxpool(x) rows).
    wf = np.zeros((C, KIM), np.float32)
    for b, w in enumerate((w0, w1, w2)):
        wn = np.asarray(w, np.float32)              # (k, NF, NF), tap-major
        k = wn.shape[0]
        pad = k // 2
        for t in range(K0):                         # im2col block t <-> shift t-19
            tt = (t - PADMAX) + pad
            if 0 <= tt < k:
                wf[b * NF:(b + 1) * NF, t * NF:(t + 1) * NF] = wn[tt]
    wf[3 * NF:4 * NF, K0 * NF:] = np.asarray(wmp, np.float32)
    wf *= scale1[:, None]                           # fold BN1 per-out-channel scale

    aff = np.stack([bias1, scale2, shift2], axis=0)[:, :, None]   # (3, C, 1)
    return (jnp.asarray(np.asarray(wb, np.float32), jnp.bfloat16),
            jnp.asarray(wf, jnp.bfloat16),
            jnp.asarray(aff, jnp.float32))


def init_params(key):
    kb, k0, k1, k2, kmp, kn1, kn2 = jax.random.split(key, 7)

    # 1x1 convs: PyTorch weight (out, in, 1) -> (out, in)
    wb = jax.random.normal(kb, (NF, D_MODEL), jnp.float32) / math.sqrt(D_MODEL)
    wmp = jax.random.normal(kmp, (NF, D_MODEL), jnp.float32) / math.sqrt(D_MODEL)

    def conv_w(k, ksz):
        # PyTorch layout (out, in, k) -> tap-major (k, out, in)
        w = jax.random.normal(k, (NF, NF, ksz), jnp.float32) / math.sqrt(NF * ksz)
        return jnp.transpose(w, (2, 0, 1))

    w0, w1, w2 = conv_w(k0, KS[0]), conv_w(k1, KS[1]), conv_w(k2, KS[2])

    def bn_params(k):
        kg, kb_, km, kv = jax.random.split(k, 4)
        g = 1.0 + 0.2 * jax.random.normal(kg, (D_MODEL,), jnp.float32)
        be = 0.1 * jax.random.normal(kb_, (D_MODEL,), jnp.float32)
        m = 0.1 * jax.random.normal(km, (D_MODEL,), jnp.float32)
        v = 1.0 + 0.3 * jax.random.uniform(kv, (D_MODEL,), jnp.float32)
        return jnp.stack([g, be, m, v], axis=0)     # (4, C)

    return wb, w0, w1, w2, wmp, bn_params(kn1), bn_params(kn2)


def reference(x, raw_params):
    """Pure-JAX f32 reference of the same eval-mode forward pass (unfused)."""
    wb, w0, w1, w2, wmp, bn1, bn2 = raw_params
    N, C, L = x.shape
    yb = jnp.einsum('oc,ncl->nol', wb, x, precision='highest')

    def conv_same(y, w):
        k = w.shape[0]
        pad = k // 2
        ypad = jnp.pad(y, ((0, 0), (0, 0), (pad, pad)))
        out = jnp.zeros((N, w.shape[1], L), jnp.float32)
        for t in range(k):
            out = out + jnp.einsum('oi,nil->nol', w[t], ypad[:, :, t:t + L],
                                   precision='highest')
        return out

    b0, b1, b2 = conv_same(yb, w0), conv_same(yb, w1), conv_same(yb, w2)

    xpad = jnp.pad(x, ((0, 0), (0, 0), (1, 1)), constant_values=NEG)
    mp = jnp.maximum(jnp.maximum(xpad[:, :, :-2], xpad[:, :, 1:-1]),
                     xpad[:, :, 2:])
    b3 = jnp.einsum('oc,ncl->nol', wmp, mp, precision='highest')

    y = jnp.concatenate([b0, b1, b2, b3], axis=1)

    def bn(z, p):
        g, be, m, v = p[0], p[1], p[2], p[3]        # each (C,)
        return ((z - m[None, :, None]) * jax.lax.rsqrt(v[None, :, None] + EPS)
                * g[None, :, None] + be[None, :, None])

    y = jnp.maximum(bn(y, bn1), 0.0)
    return bn(x + y, bn2)


if __name__ == "__main__":
    key = jax.random.PRNGKey(0)
    kx, kp = jax.random.split(key)

    N, L = 16, 16                       # N*L = 256 lanes -> grid of 2 lane-dense slabs
    x = jax.random.normal(kx, (N, D_MODEL, L), jnp.float32)
    raw = init_params(kp)
    fused = prepare_fused(raw)

    out = inception_encoder_layer(x, fused)
    out = jax.block_until_ready(out)

    ref = reference(x, raw)
    # Tolerance accounts for bf16 MXU operands (f32 accumulation), per the
    # performance review; structure/folding itself is numerically exact.
    np.testing.assert_allclose(np.asarray(out), np.asarray(ref),
                               rtol=2e-2, atol=2e-2)
    print("KERNEL_OK")
</pallas_src>

<mosaic_0001>
module attributes {stable_mosaic.version = 11 : i64} {
  func.func @_inception_encoder_kernel(%arg0: i32, %arg1: memref<32x128xf32, #tpu.memory_space<vmem>>, %arg2: memref<8x32xbf16, #tpu.memory_space<vmem>>, %arg3: memref<32x344xbf16, #tpu.memory_space<vmem>>, %arg4: memref<3x32x1xf32, #tpu.memory_space<vmem>>, %arg5: memref<32x128xf32, #tpu.memory_space<vmem>>, %arg6: memref<344x128xf32, #tpu.memory_space<vmem>>) attributes {dimension_semantics = [#tpu.dimension_semantics<parallel>], iteration_bounds = array<i64: 2>, scalar_prefetch = 0 : i64, scratch_operands = 1 : i64, tpu.core_type = #tpu.core_type<tc>, window_params = [{transform_indices = @transform_0, window_bounds = array<i64: 32, 128>}, {pipeline_mode = #tpu.pipeline_mode<synchronous>, transform_indices = @transform_1, window_bounds = array<i64: 8, 32>}, {pipeline_mode = #tpu.pipeline_mode<synchronous>, transform_indices = @transform_2, window_bounds = array<i64: 32, 344>}, {pipeline_mode = #tpu.pipeline_mode<synchronous>, transform_indices = @transform_3, window_bounds = array<i64: 3, 32, 1>}, {transform_indices = @transform_4, window_bounds = array<i64: 32, 128>}]} {
    %c0 = arith.constant 0 : index
    %c0_0 = arith.constant 0 : index
    %0 = vector.load %arg1[%c0, %c0_0] : memref<32x128xf32, #tpu.memory_space<vmem>>, vector<32x128xf32>
    %c0_1 = arith.constant 0 : index
    %c0_2 = arith.constant 0 : index
    %1 = vector.load %arg2[%c0_1, %c0_2] : memref<8x32xbf16, #tpu.memory_space<vmem>>, vector<8x32xbf16>
    %2 = arith.truncf %0 : vector<32x128xf32> to vector<32x128xbf16>
    %cst = arith.constant dense<0.000000e+00> : vector<8x128xf32>
    %3 = tpu.matmul %1, %2, %cst {dimension_numbers = #tpu.dot_dimension_numbers<[1], [0], [0], [1], [0, 0, 1, 1], [], []>} : vector<8x32xbf16>, vector<32x128xbf16>, vector<8x128xf32> -> vector<8x128xf32>
    %4 = tpu.iota {dimensions = array<i32: 1>} : vector<1x128xi32>
    %c16_i32 = arith.constant 16 : i32
    %c0_i32 = arith.constant 0 : i32
    %5 = arith.cmpi eq, %c16_i32, %c0_i32 : i32
    %c1_i32 = arith.constant 1 : i32
    %6 = arith.select %5, %c1_i32, %c16_i32 : i32
    %7 = vector.broadcast %6 : i32 to vector<1x128xi32>
    %8 = arith.remsi %4, %7 : vector<1x128xi32>
    %c0_i32_3 = arith.constant 0 : i32
    %9 = vector.broadcast %c0_i32_3 : i32 to vector<1x128xi32>
    %10 = arith.cmpi ne, %8, %9 : vector<1x128xi32>
    %c0_i32_4 = arith.constant 0 : i32
    %11 = vector.broadcast %c0_i32_4 : i32 to vector<1x128xi32>
    %12 = arith.cmpi slt, %8, %11 : vector<1x128xi32>
    %c0_i32_5 = arith.constant 0 : i32
    %13 = arith.cmpi slt, %6, %c0_i32_5 : i32
    %14 = vector.broadcast %13 : i1 to vector<1x128xi1>
    %15 = vector.broadcast %14 : vector<1x128xi1> to vector<1x128xi1>
    %16 = arith.xori %12, %15 : vector<1x128xi1>
    %17 = arith.andi %16, %10 : vector<1x128xi1>
    %18 = vector.broadcast %6 : i32 to vector<1x128xi32>
    %19 = arith.addi %8, %18 : vector<1x128xi32>
    %20 = arith.select %17, %19, %8 : vector<1x128xi1>, vector<1x128xi32>
    %c19_i32 = arith.constant 19 : i32
    %21 = tpu.dynamic_rotate %3 by %c19_i32 dim 1 : vector<8x128xf32>, i32 -> vector<8x128xf32>
    %c-19_i32 = arith.constant -19 : i32
    %22 = vector.broadcast %c-19_i32 : i32 to vector<1x128xi32>
    %23 = arith.addi %20, %22 : vector<1x128xi32>
    %c0_i32_6 = arith.constant 0 : i32
    %24 = vector.broadcast %c0_i32_6 : i32 to vector<1x128xi32>
    %25 = arith.cmpi sge, %23, %24 : vector<1x128xi32>
    %c-19_i32_7 = arith.constant -19 : i32
    %26 = vector.broadcast %c-19_i32_7 : i32 to vector<1x128xi32>
    %27 = arith.addi %20, %26 : vector<1x128xi32>
    %c16_i32_8 = arith.constant 16 : i32
    %28 = vector.broadcast %c16_i32_8 : i32 to vector<1x128xi32>
    %29 = arith.cmpi slt, %27, %28 : vector<1x128xi32>
    %30 = arith.andi %25, %29 : vector<1x128xi1>
    %cst_9 = arith.constant 0.000000e+00 : f32
    %31 = vector.shape_cast %30 : vector<1x128xi1> to vector<1x128xi1>
    %32 = vector.broadcast %31 : vector<1x128xi1> to vector<8x128xi1>
    %33 = vector.broadcast %cst_9 : f32 to vector<8x128xf32>
    %34 = arith.select %32, %21, %33 : vector<8x128xi1>, vector<8x128xf32>
    %c0_10 = arith.constant 0 : index
    %c0_11 = arith.constant 0 : index
    %35 = vector.load %arg6[%c0_10, %c0_11] : memref<344x128xf32, #tpu.memory_space<vmem>>, vector<8x128xf32>
    tpu.vector_store %arg6[%c0_10, %c0_11], %34 {strides = array<i32>} : memref<344x128xf32, #tpu.memory_space<vmem>>, vector<8x128xf32>,
    %c18_i32 = arith.constant 18 : i32
    %36 = tpu.dynamic_rotate %3 by %c18_i32 dim 1 : vector<8x128xf32>, i32 -> vector<8x128xf32>
    %c-18_i32 = arith.constant -18 : i32
    %37 = vector.broadcast %c-18_i32 : i32 to vector<1x128xi32>
    %38 = arith.addi %20, %37 : vector<1x128xi32>
    %c0_i32_12 = arith.constant 0 : i32
    %39 = vector.broadcast %c0_i32_12 : i32 to vector<1x128xi32>
    %40 = arith.cmpi sge, %38, %39 : vector<1x128xi32>
    %c-18_i32_13 = arith.constant -18 : i32
    %41 = vector.broadcast %c-18_i32_13 : i32 to vector<1x128xi32>
    %42 = arith.addi %20, %41 : vector<1x128xi32>
    %c16_i32_14 = arith.constant 16 : i32
    %43 = vector.broadcast %c16_i32_14 : i32 to vector<1x128xi32>
    %44 = arith.cmpi slt, %42, %43 : vector<1x128xi32>
    %45 = arith.andi %40, %44 : vector<1x128xi1>
    %cst_15 = arith.constant 0.000000e+00 : f32
    %46 = vector.shape_cast %45 : vector<1x128xi1> to vector<1x128xi1>
    %47 = vector.broadcast %46 : vector<1x128xi1> to vector<8x128xi1>
    %48 = vector.broadcast %cst_15 : f32 to vector<8x128xf32>
    %49 = arith.select %47, %36, %48 : vector<8x128xi1>, vector<8x128xf32>
    %c8 = arith.constant 8 : index
    %c0_16 = arith.constant 0 : index
    %50 = vector.load %arg6[%c8, %c0_16] : memref<344x128xf32, #tpu.memory_space<vmem>>, vector<8x128xf32>
    tpu.vector_store %arg6[%c8, %c0_16], %49 {strides = array<i32>} : memref<344x128xf32, #tpu.memory_space<vmem>>, vector<8x128xf32>,
    %c17_i32 = arith.constant 17 : i32
    %51 = tpu.dynamic_rotate %3 by %c17_i32 dim 1 : vector<8x128xf32>, i32 -> vector<8x128xf32>
    %c-17_i32 = arith.constant -17 : i32
    %52 = vector.broadcast %c-17_i32 : i32 to vector<1x128xi32>
    %53 = arith.addi %20, %52 : vector<1x128xi32>
    %c0_i32_17 = arith.constant 0 : i32
    %54 = vector.broadcast %c0_i32_17 : i32 to vector<1x128xi32>
    %55 = arith.cmpi sge, %53, %54 : vector<1x128xi32>
    %c-17_i32_18 = arith.constant -17 : i32
    %56 = vector.broadcast %c-17_i32_18 : i32 to vector<1x128xi32>
    %57 = arith.addi %20, %56 : vector<1x128xi32>
    %c16_i32_19 = arith.constant 16 : i32
    %58 = vector.broadcast %c16_i32_19 : i32 to vector<1x128xi32>
    %59 = arith.cmpi slt, %57, %58 : vector<1x128xi32>
    %60 = arith.andi %55, %59 : vector<1x128xi1>
    %cst_20 = arith.constant 0.000000e+00 : f32
    %61 = vector.shape_cast %60 : vector<1x128xi1> to vector<1x128xi1>
    %62 = vector.broadcast %61 : vector<1x128xi1> to vector<8x128xi1>
    %63 = vector.broadcast %cst_20 : f32 to vector<8x128xf32>
    %64 = arith.select %62, %51, %63 : vector<8x128xi1>, vector<8x128xf32>
    %c16 = arith.constant 16 : index
    %c0_21 = arith.constant 0 : index
    %65 = vector.load %arg6[%c16, %c0_21] : memref<344x128xf32, #tpu.memory_space<vmem>>, vector<8x128xf32>
    tpu.vector_store %arg6[%c16, %c0_21], %64 {strides = array<i32>} : memref<344x128xf32, #tpu.memory_space<vmem>>, vector<8x128xf32>,
    %c16_i32_22 = arith.constant 16 : i32
    %66 = tpu.dynamic_rotate %3 by %c16_i32_22 dim 1 : vector<8x128xf32>, i32 -> vector<8x128xf32>
    %c-16_i32 = arith.constant -16 : i32
    %67 = vector.broadcast %c-16_i32 : i32 to vector<1x128xi32>
    %68 = arith.addi %20, %67 : vector<1x128xi32>
    %c0_i32_23 = arith.constant 0 : i32
    %69 = vector.broadcast %c0_i32_23 : i32 to vector<1x128xi32>
    %70 = arith.cmpi sge, %68, %69 : vector<1x128xi32>
    %c-16_i32_24 = arith.constant -16 : i32
    %71 = vector.broadcast %c-16_i32_24 : i32 to vector<1x128xi32>
    %72 = arith.addi %20, %71 : vector<1x128xi32>
    %c16_i32_25 = arith.constant 16 : i32
    %73 = vector.broadcast %c16_i32_25 : i32 to vector<1x128xi32>
    %74 = arith.cmpi slt, %72, %73 : vector<1x128xi32>
    %75 = arith.andi %70, %74 : vector<1x128xi1>
    %cst_26 = arith.constant 0.000000e+00 : f32
    %76 = vector.shape_cast %75 : vector<1x128xi1> to vector<1x128xi1>
    %77 = vector.broadcast %76 : vector<1x128xi1> to vector<8x128xi1>
    %78 = vector.broadcast %cst_26 : f32 to vector<8x128xf32>
    %79 = arith.select %77, %66, %78 : vector<8x128xi1>, vector<8x128xf32>
    %c24 = arith.constant 24 : index
    %c0_27 = arith.constant 0 : index
    %80 = vector.load %arg6[%c24, %c0_27] : memref<344x128xf32, #tpu.memory_space<vmem>>, vector<8x128xf32>
    tpu.vector_store %arg6[%c24, %c0_27], %79 {strides = array<i32>} : memref<344x128xf32, #tpu.memory_space<vmem>>, vector<8x128xf32>,
    %c15_i32 = arith.constant 15 : i32
    %81 = tpu.dynamic_rotate %3 by %c15_i32 dim 1 : vector<8x128xf32>, i32 -> vector<8x128xf32>
    %c-15_i32 = arith.constant -15 : i32
    %82 = vector.broadcast %c-15_i32 : i32 to vector<1x128xi32>
    %83 = arith.addi %20, %82 : vector<1x128xi32>
    %c0_i32_28 = arith.constant 0 : i32
    %84 = vector.broadcast %c0_i32_28 : i32 to vector<1x128xi32>
    %85 = arith.cmpi sge, %83, %84 : vector<1x128xi32>
    %c-15_i32_29 = arith.constant -15 : i32
    %86 = vector.broadcast %c-15_i32_29 : i32 to vector<1x128xi32>
    %87 = arith.addi %20, %86 : vector<1x128xi32>
    %c16_i32_30 = arith.constant 16 : i32
    %88 = vector.broadcast %c16_i32_30 : i32 to vector<1x128xi32>
    %89 = arith.cmpi slt, %87, %88 : vector<1x128xi32>
    %90 = arith.andi %85, %89 : vector<1x128xi1>
    %cst_31 = arith.constant 0.000000e+00 : f32
    %91 = vector.shape_cast %90 : vector<1x128xi1> to vector<1x128xi1>
    %92 = vector.broadcast %91 : vector<1x128xi1> to vector<8x128xi1>
    %93 = vector.broadcast %cst_31 : f32 to vector<8x128xf32>
    %94 = arith.select %92, %81, %93 : vector<8x128xi1>, vector<8x128xf32>
    %c32 = arith.constant 32 : index
    %c0_32 = arith.constant 0 : index
    %95 = vector.load %arg6[%c32, %c0_32] : memref<344x128xf32, #tpu.memory_space<vmem>>, vector<8x128xf32>
    tpu.vector_store %arg6[%c32, %c0_32], %94 {strides = array<i32>} : memref<344x128xf32, #tpu.memory_space<vmem>>, vector<8x128xf32>,
    %c14_i32 = arith.constant 14 : i32
    %96 = tpu.dynamic_rotate %3 by %c14_i32 dim 1 : vector<8x128xf32>, i32 -> vector<8x128xf32>
    %c-14_i32 = arith.constant -14 : i32
    %97 = vector.broadcast %c-14_i32 : i32 to vector<1x128xi32>
    %98 = arith.addi %20, %97 : vector<1x128xi32>
    %c0_i32_33 = arith.constant 0 : i32
    %99 = vector.broadcast %c0_i32_33 : i32 to vector<1x128xi32>
    %100 = arith.cmpi sge, %98, %99 : vector<1x128xi32>
    %c-14_i32_34 = arith.constant -14 : i32
    %101 = vector.broadcast %c-14_i32_34 : i32 to vector<1x128xi32>
    %102 = arith.addi %20, %101 : vector<1x128xi32>
    %c16_i32_35 = arith.constant 16 : i32
    %103 = vector.broadcast %c16_i32_35 : i32 to vector<1x128xi32>
    %104 = arith.cmpi slt, %102, %103 : vector<1x128xi32>
    %105 = arith.andi %100, %104 : vector<1x128xi1>
    %cst_36 = arith.constant 0.000000e+00 : f32
    %106 = vector.shape_cast %105 : vector<1x128xi1> to vector<1x128xi1>
    %107 = vector.broadcast %106 : vector<1x128xi1> to vector<8x128xi1>
    %108 = vector.broadcast %cst_36 : f32 to vector<8x128xf32>
    %109 = arith.select %107, %96, %108 : vector<8x128xi1>, vector<8x128xf32>
    %c40 = arith.constant 40 : index
    %c0_37 = arith.constant 0 : index
    %110 = vector.load %arg6[%c40, %c0_37] : memref<344x128xf32, #tpu.memory_space<vmem>>, vector<8x128xf32>
    tpu.vector_store %arg6[%c40, %c0_37], %109 {strides = array<i32>} : memref<344x128xf32, #tpu.memory_space<vmem>>, vector<8x128xf32>,
    %c13_i32 = arith.constant 13 : i32
    %111 = tpu.dynamic_rotate %3 by %c13_i32 dim 1 : vector<8x128xf32>, i32 -> vector<8x128xf32>
    %c-13_i32 = arith.constant -13 : i32
    %112 = vector.broadcast %c-13_i32 : i32 to vector<1x128xi32>
    %113 = arith.addi %20, %112 : vector<1x128xi32>
    %c0_i32_38 = arith.constant 0 : i32
    %114 = vector.broadcast %c0_i32_38 : i32 to vector<1x128xi32>
    %115 = arith.cmpi sge, %113, %114 : vector<1x128xi32>
    %c-13_i32_39 = arith.constant -13 : i32
    %116 = vector.broadcast %c-13_i32_39 : i32 to vector<1x128xi32>
    %117 = arith.addi %20, %116 : vector<1x128xi32>
    %c16_i32_40 = arith.constant 16 : i32
    %118 = vector.broadcast %c16_i32_40 : i32 to vector<1x128xi32>
    %119 = arith.cmpi slt, %117, %118 : vector<1x128xi32>
    %120 = arith.andi %115, %119 : vector<1x128xi1>
    %cst_41 = arith.constant 0.000000e+00 : f32
    %121 = vector.shape_cast %120 : vector<1x128xi1> to vector<1x128xi1>
    %122 = vector.broadcast %121 : vector<1x128xi1> to vector<8x128xi1>
    %123 = vector.broadcast %cst_41 : f32 to vector<8x128xf32>
    %124 = arith.select %122, %111, %123 : vector<8x128xi1>, vector<8x128xf32>
    %c48 = arith.constant 48 : index
    %c0_42 = arith.constant 0 : index
    %125 = vector.load %arg6[%c48, %c0_42] : memref<344x128xf32, #tpu.memory_space<vmem>>, vector<8x128xf32>
    tpu.vector_store %arg6[%c48, %c0_42], %124 {strides = array<i32>} : memref<344x128xf32, #tpu.memory_space<vmem>>, vector<8x128xf32>,
    %c12_i32 = arith.constant 12 : i32
    %126 = tpu.dynamic_rotate %3 by %c12_i32 dim 1 : vector<8x128xf32>, i32 -> vector<8x128xf32>
    %c-12_i32 = arith.constant -12 : i32
    %127 = vector.broadcast %c-12_i32 : i32 to vector<1x128xi32>
    %128 = arith.addi %20, %127 : vector<1x128xi32>
    %c0_i32_43 = arith.constant 0 : i32
    %129 = vector.broadcast %c0_i32_43 : i32 to vector<1x128xi32>
    %130 = arith.cmpi sge, %128, %129 : vector<1x128xi32>
    %c-12_i32_44 = arith.constant -12 : i32
    %131 = vector.broadcast %c-12_i32_44 : i32 to vector<1x128xi32>
    %132 = arith.addi %20, %131 : vector<1x128xi32>
    %c16_i32_45 = arith.constant 16 : i32
    %133 = vector.broadcast %c16_i32_45 : i32 to vector<1x128xi32>
    %134 = arith.cmpi slt, %132, %133 : vector<1x128xi32>
    %135 = arith.andi %130, %134 : vector<1x128xi1>
    %cst_46 = arith.constant 0.000000e+00 : f32
    %136 = vector.shape_cast %135 : vector<1x128xi1> to vector<1x128xi1>
    %137 = vector.broadcast %136 : vector<1x128xi1> to vector<8x128xi1>
    %138 = vector.broadcast %cst_46 : f32 to vector<8x128xf32>
    %139 = arith.select %137, %126, %138 : vector<8x128xi1>, vector<8x128xf32>
    %c56 = arith.constant 56 : index
    %c0_47 = arith.constant 0 : index
    %140 = vector.load %arg6[%c56, %c0_47] : memref<344x128xf32, #tpu.memory_space<vmem>>, vector<8x128xf32>
    tpu.vector_store %arg6[%c56, %c0_47], %139 {strides = array<i32>} : memref<344x128xf32, #tpu.memory_space<vmem>>, vector<8x128xf32>,
    %c11_i32 = arith.constant 11 : i32
    %141 = tpu.dynamic_rotate %3 by %c11_i32 dim 1 : vector<8x128xf32>, i32 -> vector<8x128xf32>
    %c-11_i32 = arith.constant -11 : i32
    %142 = vector.broadcast %c-11_i32 : i32 to vector<1x128xi32>
    %143 = arith.addi %20, %142 : vector<1x128xi32>
    %c0_i32_48 = arith.constant 0 : i32
    %144 = vector.broadcast %c0_i32_48 : i32 to vector<1x128xi32>
    %145 = arith.cmpi sge, %143, %144 : vector<1x128xi32>
    %c-11_i32_49 = arith.constant -11 : i32
    %146 = vector.broadcast %c-11_i32_49 : i32 to vector<1x128xi32>
    %147 = arith.addi %20, %146 : vector<1x128xi32>
    %c16_i32_50 = arith.constant 16 : i32
    %148 = vector.broadcast %c16_i32_50 : i32 to vector<1x128xi32>
    %149 = arith.cmpi slt, %147, %148 : vector<1x128xi32>
    %150 = arith.andi %145, %149 : vector<1x128xi1>
    %cst_51 = arith.constant 0.000000e+00 : f32
    %151 = vector.shape_cast %150 : vector<1x128xi1> to vector<1x128xi1>
    %152 = vector.broadcast %151 : vector<1x128xi1> to vector<8x128xi1>
    %153 = vector.broadcast %cst_51 : f32 to vector<8x128xf32>
    %154 = arith.select %152, %141, %153 : vector<8x128xi1>, vector<8x128xf32>
    %c64 = arith.constant 64 : index
    %c0_52 = arith.constant 0 : index
    %155 = vector.load %arg6[%c64, %c0_52] : memref<344x128xf32, #tpu.memory_space<vmem>>, vector<8x128xf32>
    tpu.vector_store %arg6[%c64, %c0_52], %154 {strides = array<i32>} : memref<344x128xf32, #tpu.memory_space<vmem>>, vector<8x128xf32>,
    %c10_i32 = arith.constant 10 : i32
    %156 = tpu.dynamic_rotate %3 by %c10_i32 dim 1 : vector<8x128xf32>, i32 -> vector<8x128xf32>
    %c-10_i32 = arith.constant -10 : i32
    %157 = vector.broadcast %c-10_i32 : i32 to vector<1x128xi32>
    %158 = arith.addi %20, %157 : vector<1x128xi32>
    %c0_i32_53 = arith.constant 0 : i32
    %159 = vector.broadcast %c0_i32_53 : i32 to vector<1x128xi32>
    %160 = arith.cmpi sge, %158, %159 : vector<1x128xi32>
    %c-10_i32_54 = arith.constant -10 : i32
    %161 = vector.broadcast %c-10_i32_54 : i32 to vector<1x128xi32>
    %162 = arith.addi %20, %161 : vector<1x128xi32>
    %c16_i32_55 = arith.constant 16 : i32
    %163 = vector.broadcast %c16_i32_55 : i32 to vector<1x128xi32>
    %164 = arith.cmpi slt, %162, %163 : vector<1x128xi32>
    %165 = arith.andi %160, %164 : vector<1x128xi1>
    %cst_56 = arith.constant 0.000000e+00 : f32
    %166 = vector.shape_cast %165 : vector<1x128xi1> to vector<1x128xi1>
    %167 = vector.broadcast %166 : vector<1x128xi1> to vector<8x128xi1>
    %168 = vector.broadcast %cst_56 : f32 to vector<8x128xf32>
    %169 = arith.select %167, %156, %168 : vector<8x128xi1>, vector<8x128xf32>
    %c72 = arith.constant 72 : index
    %c0_57 = arith.constant 0 : index
    %170 = vector.load %arg6[%c72, %c0_57] : memref<344x128xf32, #tpu.memory_space<vmem>>, vector<8x128xf32>
    tpu.vector_store %arg6[%c72, %c0_57], %169 {strides = array<i32>} : memref<344x128xf32, #tpu.memory_space<vmem>>, vector<8x128xf32>,
    %c9_i32 = arith.constant 9 : i32
    %171 = tpu.dynamic_rotate %3 by %c9_i32 dim 1 : vector<8x128xf32>, i32 -> vector<8x128xf32>
    %c-9_i32 = arith.constant -9 : i32
    %172 = vector.broadcast %c-9_i32 : i32 to vector<1x128xi32>
    %173 = arith.addi %20, %172 : vector<1x128xi32>
    %c0_i32_58 = arith.constant 0 : i32
    %174 = vector.broadcast %c0_i32_58 : i32 to vector<1x128xi32>
    %175 = arith.cmpi sge, %173, %174 : vector<1x128xi32>
    %c-9_i32_59 = arith.constant -9 : i32
    %176 = vector.broadcast %c-9_i32_59 : i32 to vector<1x128xi32>
    %177 = arith.addi %20, %176 : vector<1x128xi32>
    %c16_i32_60 = arith.constant 16 : i32
    %178 = vector.broadcast %c16_i32_60 : i32 to vector<1x128xi32>
    %179 = arith.cmpi slt, %177, %178 : vector<1x128xi32>
    %180 = arith.andi %175, %179 : vector<1x128xi1>
    %cst_61 = arith.constant 0.000000e+00 : f32
    %181 = vector.shape_cast %180 : vector<1x128xi1> to vector<1x128xi1>
    %182 = vector.broadcast %181 : vector<1x128xi1> to vector<8x128xi1>
    %183 = vector.broadcast %cst_61 : f32 to vector<8x128xf32>
    %184 = arith.select %182, %171, %183 : vector<8x128xi1>, vector<8x128xf32>
    %c80 = arith.constant 80 : index
    %c0_62 = arith.constant 0 : index
    %185 = vector.load %arg6[%c80, %c0_62] : memref<344x128xf32, #tpu.memory_space<vmem>>, vector<8x128xf32>
    tpu.vector_store %arg6[%c80, %c0_62], %184 {strides = array<i32>} : memref<344x128xf32, #tpu.memory_space<vmem>>, vector<8x128xf32>,
    %c8_i32 = arith.constant 8 : i32
    %186 = tpu.dynamic_rotate %3 by %c8_i32 dim 1 : vector<8x128xf32>, i32 -> vector<8x128xf32>
    %c-8_i32 = arith.constant -8 : i32
    %187 = vector.broadcast %c-8_i32 : i32 to vector<1x128xi32>
    %188 = arith.addi %20, %187 : vector<1x128xi32>
    %c0_i32_63 = arith.constant 0 : i32
    %189 = vector.broadcast %c0_i32_63 : i32 to vector<1x128xi32>
    %190 = arith.cmpi sge, %188, %189 : vector<1x128xi32>
    %c-8_i32_64 = arith.constant -8 : i32
    %191 = vector.broadcast %c-8_i32_64 : i32 to vector<1x128xi32>
    %192 = arith.addi %20, %191 : vector<1x128xi32>
    %c16_i32_65 = arith.constant 16 : i32
    %193 = vector.broadcast %c16_i32_65 : i32 to vector<1x128xi32>
    %194 = arith.cmpi slt, %192, %193 : vector<1x128xi32>
    %195 = arith.andi %190, %194 : vector<1x128xi1>
    %cst_66 = arith.constant 0.000000e+00 : f32
    %196 = vector.shape_cast %195 : vector<1x128xi1> to vector<1x128xi1>
    %197 = vector.broadcast %196 : vector<1x128xi1> to vector<8x128xi1>
    %198 = vector.broadcast %cst_66 : f32 to vector<8x128xf32>
    %199 = arith.select %197, %186, %198 : vector<8x128xi1>, vector<8x128xf32>
    %c88 = arith.constant 88 : index
    %c0_67 = arith.constant 0 : index
    %200 = vector.load %arg6[%c88, %c0_67] : memref<344x128xf32, #tpu.memory_space<vmem>>, vector<8x128xf32>
    tpu.vector_store %arg6[%c88, %c0_67], %199 {strides = array<i32>} : memref<344x128xf32, #tpu.memory_space<vmem>>, vector<8x128xf32>,
    %c7_i32 = arith.constant 7 : i32
    %201 = tpu.dynamic_rotate %3 by %c7_i32 dim 1 : vector<8x128xf32>, i32 -> vector<8x128xf32>
    %c-7_i32 = arith.constant -7 : i32
    %202 = vector.broadcast %c-7_i32 : i32 to vector<1x128xi32>
    %203 = arith.addi %20, %202 : vector<1x128xi32>
    %c0_i32_68 = arith.constant 0 : i32
    %204 = vector.broadcast %c0_i32_68 : i32 to vector<1x128xi32>
    %205 = arith.cmpi sge, %203, %204 : vector<1x128xi32>
    %c-7_i32_69 = arith.constant -7 : i32
    %206 = vector.broadcast %c-7_i32_69 : i32 to vector<1x128xi32>
    %207 = arith.addi %20, %206 : vector<1x128xi32>
    %c16_i32_70 = arith.constant 16 : i32
    %208 = vector.broadcast %c16_i32_70 : i32 to vector<1x128xi32>
    %209 = arith.cmpi slt, %207, %208 : vector<1x128xi32>
    %210 = arith.andi %205, %209 : vector<1x128xi1>
    %cst_71 = arith.constant 0.000000e+00 : f32
    %211 = vector.shape_cast %210 : vector<1x128xi1> to vector<1x128xi1>
    %212 = vector.broadcast %211 : vector<1x128xi1> to vector<8x128xi1>
    %213 = vector.broadcast %cst_71 : f32 to vector<8x128xf32>
    %214 = arith.select %212, %201, %213 : vector<8x128xi1>, vector<8x128xf32>
    %c96 = arith.constant 96 : index
    %c0_72 = arith.constant 0 : index
    %215 = vector.load %arg6[%c96, %c0_72] : memref<344x128xf32, #tpu.memory_space<vmem>>, vector<8x128xf32>
    tpu.vector_store %arg6[%c96, %c0_72], %214 {strides = array<i32>} : memref<344x128xf32, #tpu.memory_space<vmem>>, vector<8x128xf32>,
    %c6_i32 = arith.constant 6 : i32
    %216 = tpu.dynamic_rotate %3 by %c6_i32 dim 1 : vector<8x128xf32>, i32 -> vector<8x128xf32>
    %c-6_i32 = arith.constant -6 : i32
    %217 = vector.broadcast %c-6_i32 : i32 to vector<1x128xi32>
    %218 = arith.addi %20, %217 : vector<1x128xi32>
    %c0_i32_73 = arith.constant 0 : i32
    %219 = vector.broadcast %c0_i32_73 : i32 to vector<1x128xi32>
    %220 = arith.cmpi sge, %218, %219 : vector<1x128xi32>
    %c-6_i32_74 = arith.constant -6 : i32
    %221 = vector.broadcast %c-6_i32_74 : i32 to vector<1x128xi32>
    %222 = arith.addi %20, %221 : vector<1x128xi32>
    %c16_i32_75 = arith.constant 16 : i32
    %223 = vector.broadcast %c16_i32_75 : i32 to vector<1x128xi32>
    %224 = arith.cmpi slt, %222, %223 : vector<1x128xi32>
    %225 = arith.andi %220, %224 : vector<1x128xi1>
    %cst_76 = arith.constant 0.000000e+00 : f32
    %226 = vector.shape_cast %225 : vector<1x128xi1> to vector<1x128xi1>
    %227 = vector.broadcast %226 : vector<1x128xi1> to vector<8x128xi1>
    %228 = vector.broadcast %cst_76 : f32 to vector<8x128xf32>
    %229 = arith.select %227, %216, %228 : vector<8x128xi1>, vector<8x128xf32>
    %c104 = arith.constant 104 : index
    %c0_77 = arith.constant 0 : index
    %230 = vector.load %arg6[%c104, %c0_77] : memref<344x128xf32, #tpu.memory_space<vmem>>, vector<8x128xf32>
    tpu.vector_store %arg6[%c104, %c0_77], %229 {strides = array<i32>} : memref<344x128xf32, #tpu.memory_space<vmem>>, vector<8x128xf32>,
    %c5_i32 = arith.constant 5 : i32
    %231 = tpu.dynamic_rotate %3 by %c5_i32 dim 1 : vector<8x128xf32>, i32 -> vector<8x128xf32>
    %c-5_i32 = arith.constant -5 : i32
    %232 = vector.broadcast %c-5_i32 : i32 to vector<1x128xi32>
    %233 = arith.addi %20, %232 : vector<1x128xi32>
    %c0_i32_78 = arith.constant 0 : i32
    %234 = vector.broadcast %c0_i32_78 : i32 to vector<1x128xi32>
    %235 = arith.cmpi sge, %233, %234 : vector<1x128xi32>
    %c-5_i32_79 = arith.constant -5 : i32
    %236 = vector.broadcast %c-5_i32_79 : i32 to vector<1x128xi32>
    %237 = arith.addi %20, %236 : vector<1x128xi32>
    %c16_i32_80 = arith.constant 16 : i32
    %238 = vector.broadcast %c16_i32_80 : i32 to vector<1x128xi32>
    %239 = arith.cmpi slt, %237, %238 : vector<1x128xi32>
    %240 = arith.andi %235, %239 : vector<1x128xi1>
    %cst_81 = arith.constant 0.000000e+00 : f32
    %241 = vector.shape_cast %240 : vector<1x128xi1> to vector<1x128xi1>
    %242 = vector.broadcast %241 : vector<1x128xi1> to vector<8x128xi1>
    %243 = vector.broadcast %cst_81 : f32 to vector<8x128xf32>
    %244 = arith.select %242, %231, %243 : vector<8x128xi1>, vector<8x128xf32>
    %c112 = arith.constant 112 : index
    %c0_82 = arith.constant 0 : index
    %245 = vector.load %arg6[%c112, %c0_82] : memref<344x128xf32, #tpu.memory_space<vmem>>, vector<8x128xf32>
    tpu.vector_store %arg6[%c112, %c0_82], %244 {strides = array<i32>} : memref<344x128xf32, #tpu.memory_space<vmem>>, vector<8x128xf32>,
    %c4_i32 = arith.constant 4 : i32
    %246 = tpu.dynamic_rotate %3 by %c4_i32 dim 1 : vector<8x128xf32>, i32 -> vector<8x128xf32>
    %c-4_i32 = arith.constant -4 : i32
    %247 = vector.broadcast %c-4_i32 : i32 to vector<1x128xi32>
    %248 = arith.addi %20, %247 : vector<1x128xi32>
    %c0_i32_83 = arith.constant 0 : i32
    %249 = vector.broadcast %c0_i32_83 : i32 to vector<1x128xi32>
    %250 = arith.cmpi sge, %248, %249 : vector<1x128xi32>
    %c-4_i32_84 = arith.constant -4 : i32
    %251 = vector.broadcast %c-4_i32_84 : i32 to vector<1x128xi32>
    %252 = arith.addi %20, %251 : vector<1x128xi32>
    %c16_i32_85 = arith.constant 16 : i32
    %253 = vector.broadcast %c16_i32_85 : i32 to vector<1x128xi32>
    %254 = arith.cmpi slt, %252, %253 : vector<1x128xi32>
    %255 = arith.andi %250, %254 : vector<1x128xi1>
    %cst_86 = arith.constant 0.000000e+00 : f32
    %256 = vector.shape_cast %255 : vector<1x128xi1> to vector<1x128xi1>
    %257 = vector.broadcast %256 : vector<1x128xi1> to vector<8x128xi1>
    %258 = vector.broadcast %cst_86 : f32 to vector<8x128xf32>
    %259 = arith.select %257, %246, %258 : vector<8x128xi1>, vector<8x128xf32>
    %c120 = arith.constant 120 : index
    %c0_87 = arith.constant 0 : index
    %260 = vector.load %arg6[%c120, %c0_87] : memref<344x128xf32, #tpu.memory_space<vmem>>, vector<8x128xf32>
    tpu.vector_store %arg6[%c120, %c0_87], %259 {strides = array<i32>} : memref<344x128xf32, #tpu.memory_space<vmem>>, vector<8x128xf32>,
    %c3_i32 = arith.constant 3 : i32
    %261 = tpu.dynamic_rotate %3 by %c3_i32 dim 1 : vector<8x128xf32>, i32 -> vector<8x128xf32>
    %c-3_i32 = arith.constant -3 : i32
    %262 = vector.broadcast %c-3_i32 : i32 to vector<1x128xi32>
    %263 = arith.addi %20, %262 : vector<1x128xi32>
    %c0_i32_88 = arith.constant 0 : i32
    %264 = vector.broadcast %c0_i32_88 : i32 to vector<1x128xi32>
    %265 = arith.cmpi sge, %263, %264 : vector<1x128xi32>
    %c-3_i32_89 = arith.constant -3 : i32
    %266 = vector.broadcast %c-3_i32_89 : i32 to vector<1x128xi32>
    %267 = arith.addi %20, %266 : vector<1x128xi32>
    %c16_i32_90 = arith.constant 16 : i32
    %268 = vector.broadcast %c16_i32_90 : i32 to vector<1x128xi32>
    %269 = arith.cmpi slt, %267, %268 : vector<1x128xi32>
    %270 = arith.andi %265, %269 : vector<1x128xi1>
    %cst_91 = arith.constant 0.000000e+00 : f32
    %271 = vector.shape_cast %270 : vector<1x128xi1> to vector<1x128xi1>
    %272 = vector.broadcast %271 : vector<1x128xi1> to vector<8x128xi1>
    %273 = vector.broadcast %cst_91 : f32 to vector<8x128xf32>
    %274 = arith.select %272, %261, %273 : vector<8x128xi1>, vector<8x128xf32>
    %c128 = arith.constant 128 : index
    %c0_92 = arith.constant 0 : index
    %275 = vector.load %arg6[%c128, %c0_92] : memref<344x128xf32, #tpu.memory_space<vmem>>, vector<8x128xf32>
    tpu.vector_store %arg6[%c128, %c0_92], %274 {strides = array<i32>} : memref<344x128xf32, #tpu.memory_space<vmem>>, vector<8x128xf32>,
    %c2_i32 = arith.constant 2 : i32
    %276 = tpu.dynamic_rotate %3 by %c2_i32 dim 1 : vector<8x128xf32>, i32 -> vector<8x128xf32>
    %c-2_i32 = arith.constant -2 : i32
    %277 = vector.broadcast %c-2_i32 : i32 to vector<1x128xi32>
    %278 = arith.addi %20, %277 : vector<1x128xi32>
    %c0_i32_93 = arith.constant 0 : i32
    %279 = vector.broadcast %c0_i32_93 : i32 to vector<1x128xi32>
    %280 = arith.cmpi sge, %278, %279 : vector<1x128xi32>
    %c-2_i32_94 = arith.constant -2 : i32
    %281 = vector.broadcast %c-2_i32_94 : i32 to vector<1x128xi32>
    %282 = arith.addi %20, %281 : vector<1x128xi32>
    %c16_i32_95 = arith.constant 16 : i32
    %283 = vector.broadcast %c16_i32_95 : i32 to vector<1x128xi32>
    %284 = arith.cmpi slt, %282, %283 : vector<1x128xi32>
    %285 = arith.andi %280, %284 : vector<1x128xi1>
    %cst_96 = arith.constant 0.000000e+00 : f32
    %286 = vector.shape_cast %285 : vector<1x128xi1> to vector<1x128xi1>
    %287 = vector.broadcast %286 : vector<1x128xi1> to vector<8x128xi1>
    %288 = vector.broadcast %cst_96 : f32 to vector<8x128xf32>
    %289 = arith.select %287, %276, %288 : vector<8x128xi1>, vector<8x128xf32>
    %c136 = arith.constant 136 : index
    %c0_97 = arith.constant 0 : index
    %290 = vector.load %arg6[%c136, %c0_97] : memref<344x128xf32, #tpu.memory_space<vmem>>, vector<8x128xf32>
    tpu.vector_store %arg6[%c136, %c0_97], %289 {strides = array<i32>} : memref<344x128xf32, #tpu.memory_space<vmem>>, vector<8x128xf32>,
    %c1_i32_98 = arith.constant 1 : i32
    %291 = tpu.dynamic_rotate %3 by %c1_i32_98 dim 1 : vector<8x128xf32>, i32 -> vector<8x128xf32>
    %c-1_i32 = arith.constant -1 : i32
    %292 = vector.broadcast %c-1_i32 : i32 to vector<1x128xi32>
    %293 = arith.addi %20, %292 : vector<1x128xi32>
    %c0_i32_99 = arith.constant 0 : i32
    %294 = vector.broadcast %c0_i32_99 : i32 to vector<1x128xi32>
    %295 = arith.cmpi sge, %293, %294 : vector<1x128xi32>
    %c-1_i32_100 = arith.constant -1 : i32
    %296 = vector.broadcast %c-1_i32_100 : i32 to vector<1x128xi32>
    %297 = arith.addi %20, %296 : vector<1x128xi32>
    %c16_i32_101 = arith.constant 16 : i32
    %298 = vector.broadcast %c16_i32_101 : i32 to vector<1x128xi32>
    %299 = arith.cmpi slt, %297, %298 : vector<1x128xi32>
    %300 = arith.andi %295, %299 : vector<1x128xi1>
    %cst_102 = arith.constant 0.000000e+00 : f32
    %301 = vector.shape_cast %300 : vector<1x128xi1> to vector<1x128xi1>
    %302 = vector.broadcast %301 : vector<1x128xi1> to vector<8x128xi1>
    %303 = vector.broadcast %cst_102 : f32 to vector<8x128xf32>
    %304 = arith.select %302, %291, %303 : vector<8x128xi1>, vector<8x128xf32>
    %c144 = arith.constant 144 : index
    %c0_103 = arith.constant 0 : index
    %305 = vector.load %arg6[%c144, %c0_103] : memref<344x128xf32, #tpu.memory_space<vmem>>, vector<8x128xf32>
    tpu.vector_store %arg6[%c144, %c0_103], %304 {strides = array<i32>} : memref<344x128xf32, #tpu.memory_space<vmem>>, vector<8x128xf32>,
    %c0_i32_104 = arith.constant 0 : i32
    %306 = vector.broadcast %c0_i32_104 : i32 to vector<1x128xi32>
    %307 = arith.addi %20, %306 : vector<1x128xi32>
    %c0_i32_105 = arith.constant 0 : i32
    %308 = vector.broadcast %c0_i32_105 : i32 to vector<1x128xi32>
    %309 = arith.cmpi sge, %307, %308 : vector<1x128xi32>
    %c0_i32_106 = arith.constant 0 : i32
    %310 = vector.broadcast %c0_i32_106 : i32 to vector<1x128xi32>
    %311 = arith.addi %20, %310 : vector<1x128xi32>
    %c16_i32_107 = arith.constant 16 : i32
    %312 = vector.broadcast %c16_i32_107 : i32 to vector<1x128xi32>
    %313 = arith.cmpi slt, %311, %312 : vector<1x128xi32>
    %314 = arith.andi %309, %313 : vector<1x128xi1>
    %cst_108 = arith.constant 0.000000e+00 : f32
    %315 = vector.shape_cast %314 : vector<1x128xi1> to vector<1x128xi1>
    %316 = vector.broadcast %315 : vector<1x128xi1> to vector<8x128xi1>
    %317 = vector.broadcast %cst_108 : f32 to vector<8x128xf32>
    %318 = arith.select %316, %3, %317 : vector<8x128xi1>, vector<8x128xf32>
    %c152 = arith.constant 152 : index
    %c0_109 = arith.constant 0 : index
    %319 = vector.load %arg6[%c152, %c0_109] : memref<344x128xf32, #tpu.memory_space<vmem>>, vector<8x128xf32>
    tpu.vector_store %arg6[%c152, %c0_109], %318 {strides = array<i32>} : memref<344x128xf32, #tpu.memory_space<vmem>>, vector<8x128xf32>,
    %c127_i32 = arith.constant 127 : i32
    %320 = tpu.dynamic_rotate %3 by %c127_i32 dim 1 : vector<8x128xf32>, i32 -> vector<8x128xf32>
    %c1_i32_110 = arith.constant 1 : i32
    %321 = vector.broadcast %c1_i32_110 : i32 to vector<1x128xi32>
    %322 = arith.addi %20, %321 : vector<1x128xi32>
    %c0_i32_111 = arith.constant 0 : i32
    %323 = vector.broadcast %c0_i32_111 : i32 to vector<1x128xi32>
    %324 = arith.cmpi sge, %322, %323 : vector<1x128xi32>
    %c1_i32_112 = arith.constant 1 : i32
    %325 = vector.broadcast %c1_i32_112 : i32 to vector<1x128xi32>
    %326 = arith.addi %20, %325 : vector<1x128xi32>
    %c16_i32_113 = arith.constant 16 : i32
    %327 = vector.broadcast %c16_i32_113 : i32 to vector<1x128xi32>
    %328 = arith.cmpi slt, %326, %327 : vector<1x128xi32>
    %329 = arith.andi %324, %328 : vector<1x128xi1>
    %cst_114 = arith.constant 0.000000e+00 : f32
    %330 = vector.shape_cast %329 : vector<1x128xi1> to vector<1x128xi1>
    %331 = vector.broadcast %330 : vector<1x128xi1> to vector<8x128xi1>
    %332 = vector.broadcast %cst_114 : f32 to vector<8x128xf32>
    %333 = arith.select %331, %320, %332 : vector<8x128xi1>, vector<8x128xf32>
    %c160 = arith.constant 160 : index
    %c0_115 = arith.constant 0 : index
    %334 = vector.load %arg6[%c160, %c0_115] : memref<344x128xf32, #tpu.memory_space<vmem>>, vector<8x128xf32>
    tpu.vector_store %arg6[%c160, %c0_115], %333 {strides = array<i32>} : memref<344x128xf32, #tpu.memory_space<vmem>>, vector<8x128xf32>,
    %c126_i32 = arith.constant 126 : i32
    %335 = tpu.dynamic_rotate %3 by %c126_i32 dim 1 : vector<8x128xf32>, i32 -> vector<8x128xf32>
    %c2_i32_116 = arith.constant 2 : i32
    %336 = vector.broadcast %c2_i32_116 : i32 to vector<1x128xi32>
    %337 = arith.addi %20, %336 : vector<1x128xi32>
    %c0_i32_117 = arith.constant 0 : i32
    %338 = vector.broadcast %c0_i32_117 : i32 to vector<1x128xi32>
    %339 = arith.cmpi sge, %337, %338 : vector<1x128xi32>
    %c2_i32_118 = arith.constant 2 : i32
    %340 = vector.broadcast %c2_i32_118 : i32 to vector<1x128xi32>
    %341 = arith.addi %20, %340 : vector<1x128xi32>
    %c16_i32_119 = arith.constant 16 : i32
    %342 = vector.broadcast %c16_i32_119 : i32 to vector<1x128xi32>
    %343 = arith.cmpi slt, %341, %342 : vector<1x128xi32>
    %344 = arith.andi %339, %343 : vector<1x128xi1>
    %cst_120 = arith.constant 0.000000e+00 : f32
    %345 = vector.shape_cast %344 : vector<1x128xi1> to vector<1x128xi1>
    %346 = vector.broadcast %345 : vector<1x128xi1> to vector<8x128xi1>
    %347 = vector.broadcast %cst_120 : f32 to vector<8x128xf32>
    %348 = arith.select %346, %335, %347 : vector<8x128xi1>, vector<8x128xf32>
    %c168 = arith.constant 168 : index
    %c0_121 = arith.constant 0 : index
    %349 = vector.load %arg6[%c168, %c0_121] : memref<344x128xf32, #tpu.memory_space<vmem>>, vector<8x128xf32>
    tpu.vector_store %arg6[%c168, %c0_121], %348 {strides = array<i32>} : memref<344x128xf32, #tpu.memory_space<vmem>>, vector<8x128xf32>,
    %c125_i32 = arith.constant 125 : i32
    %350 = tpu.dynamic_rotate %3 by %c125_i32 dim 1 : vector<8x128xf32>, i32 -> vector<8x128xf32>
    %c3_i32_122 = arith.constant 3 : i32
    %351 = vector.broadcast %c3_i32_122 : i32 to vector<1x128xi32>
    %352 = arith.addi %20, %351 : vector<1x128xi32>
    %c0_i32_123 = arith.constant 0 : i32
    %353 = vector.broadcast %c0_i32_123 : i32 to vector<1x128xi32>
    %354 = arith.cmpi sge, %352, %353 : vector<1x128xi32>
    %c3_i32_124 = arith.constant 3 : i32
    %355 = vector.broadcast %c3_i32_124 : i32 to vector<1x128xi32>
    %356 = arith.addi %20, %355 : vector<1x128xi32>
    %c16_i32_125 = arith.constant 16 : i32
    %357 = vector.broadcast %c16_i32_125 : i32 to vector<1x128xi32>
    %358 = arith.cmpi slt, %356, %357 : vector<1x128xi32>
    %359 = arith.andi %354, %358 : vector<1x128xi1>
    %cst_126 = arith.constant 0.000000e+00 : f32
    %360 = vector.shape_cast %359 : vector<1x128xi1> to vector<1x128xi1>
    %361 = vector.broadcast %360 : vector<1x128xi1> to vector<8x128xi1>
    %362 = vector.broadcast %cst_126 : f32 to vector<8x128xf32>
    %363 = arith.select %361, %350, %362 : vector<8x128xi1>, vector<8x128xf32>
    %c176 = arith.constant 176 : index
    %c0_127 = arith.constant 0 : index
    %364 = vector.load %arg6[%c176, %c0_127] : memref<344x128xf32, #tpu.memory_space<vmem>>, vector<8x128xf32>
    tpu.vector_store %arg6[%c176, %c0_127], %363 {strides = array<i32>} : memref<344x128xf32, #tpu.memory_space<vmem>>, vector<8x128xf32>,
    %c124_i32 = arith.constant 124 : i32
    %365 = tpu.dynamic_rotate %3 by %c124_i32 dim 1 : vector<8x128xf32>, i32 -> vector<8x128xf32>
    %c4_i32_128 = arith.constant 4 : i32
    %366 = vector.broadcast %c4_i32_128 : i32 to vector<1x128xi32>
    %367 = arith.addi %20, %366 : vector<1x128xi32>
    %c0_i32_129 = arith.constant 0 : i32
    %368 = vector.broadcast %c0_i32_129 : i32 to vector<1x128xi32>
    %369 = arith.cmpi sge, %367, %368 : vector<1x128xi32>
    %c4_i32_130 = arith.constant 4 : i32
    %370 = vector.broadcast %c4_i32_130 : i32 to vector<1x128xi32>
    %371 = arith.addi %20, %370 : vector<1x128xi32>
    %c16_i32_131 = arith.constant 16 : i32
    %372 = vector.broadcast %c16_i32_131 : i32 to vector<1x128xi32>
    %373 = arith.cmpi slt, %371, %372 : vector<1x128xi32>
    %374 = arith.andi %369, %373 : vector<1x128xi1>
    %cst_132 = arith.constant 0.000000e+00 : f32
    %375 = vector.shape_cast %374 : vector<1x128xi1> to vector<1x128xi1>
    %376 = vector.broadcast %375 : vector<1x128xi1> to vector<8x128xi1>
    %377 = vector.broadcast %cst_132 : f32 to vector<8x128xf32>
    %378 = arith.select %376, %365, %377 : vector<8x128xi1>, vector<8x128xf32>
    %c184 = arith.constant 184 : index
    %c0_133 = arith.constant 0 : index
    %379 = vector.load %arg6[%c184, %c0_133] : memref<344x128xf32, #tpu.memory_space<vmem>>, vector<8x128xf32>
    tpu.vector_store %arg6[%c184, %c0_133], %378 {strides = array<i32>} : memref<344x128xf32, #tpu.memory_space<vmem>>, vector<8x128xf32>,
    %c123_i32 = arith.constant 123 : i32
    %380 = tpu.dynamic_rotate %3 by %c123_i32 dim 1 : vector<8x128xf32>, i32 -> vector<8x128xf32>
    %c5_i32_134 = arith.constant 5 : i32
    %381 = vector.broadcast %c5_i32_134 : i32 to vector<1x128xi32>
    %382 = arith.addi %20, %381 : vector<1x128xi32>
    %c0_i32_135 = arith.constant 0 : i32
    %383 = vector.broadcast %c0_i32_135 : i32 to vector<1x128xi32>
    %384 = arith.cmpi sge, %382, %383 : vector<1x128xi32>
    %c5_i32_136 = arith.constant 5 : i32
    %385 = vector.broadcast %c5_i32_136 : i32 to vector<1x128xi32>
    %386 = arith.addi %20, %385 : vector<1x128xi32>
    %c16_i32_137 = arith.constant 16 : i32
    %387 = vector.broadcast %c16_i32_137 : i32 to vector<1x128xi32>
    %388 = arith.cmpi slt, %386, %387 : vector<1x128xi32>
    %389 = arith.andi %384, %388 : vector<1x128xi1>
    %cst_138 = arith.constant 0.000000e+00 : f32
    %390 = vector.shape_cast %389 : vector<1x128xi1> to vector<1x128xi1>
    %391 = vector.broadcast %390 : vector<1x128xi1> to vector<8x128xi1>
    %392 = vector.broadcast %cst_138 : f32 to vector<8x128xf32>
    %393 = arith.select %391, %380, %392 : vector<8x128xi1>, vector<8x128xf32>
    %c192 = arith.constant 192 : index
    %c0_139 = arith.constant 0 : index
    %394 = vector.load %arg6[%c192, %c0_139] : memref<344x128xf32, #tpu.memory_space<vmem>>, vector<8x128xf32>
    tpu.vector_store %arg6[%c192, %c0_139], %393 {strides = array<i32>} : memref<344x128xf32, #tpu.memory_space<vmem>>, vector<8x128xf32>,
    %c122_i32 = arith.constant 122 : i32
    %395 = tpu.dynamic_rotate %3 by %c122_i32 dim 1 : vector<8x128xf32>, i32 -> vector<8x128xf32>
    %c6_i32_140 = arith.constant 6 : i32
    %396 = vector.broadcast %c6_i32_140 : i32 to vector<1x128xi32>
    %397 = arith.addi %20, %396 : vector<1x128xi32>
    %c0_i32_141 = arith.constant 0 : i32
    %398 = vector.broadcast %c0_i32_141 : i32 to vector<1x128xi32>
    %399 = arith.cmpi sge, %397, %398 : vector<1x128xi32>
    %c6_i32_142 = arith.constant 6 : i32
    %400 = vector.broadcast %c6_i32_142 : i32 to vector<1x128xi32>
    %401 = arith.addi %20, %400 : vector<1x128xi32>
    %c16_i32_143 = arith.constant 16 : i32
    %402 = vector.broadcast %c16_i32_143 : i32 to vector<1x128xi32>
    %403 = arith.cmpi slt, %401, %402 : vector<1x128xi32>
    %404 = arith.andi %399, %403 : vector<1x128xi1>
    %cst_144 = arith.constant 0.000000e+00 : f32
    %405 = vector.shape_cast %404 : vector<1x128xi1> to vector<1x128xi1>
    %406 = vector.broadcast %405 : vector<1x128xi1> to vector<8x128xi1>
    %407 = vector.broadcast %cst_144 : f32 to vector<8x128xf32>
    %408 = arith.select %406, %395, %407 : vector<8x128xi1>, vector<8x128xf32>
    %c200 = arith.constant 200 : index
    %c0_145 = arith.constant 0 : index
    %409 = vector.load %arg6[%c200, %c0_145] : memref<344x128xf32, #tpu.memory_space<vmem>>, vector<8x128xf32>
    tpu.vector_store %arg6[%c200, %c0_145], %408 {strides = array<i32>} : memref<344x128xf32, #tpu.memory_space<vmem>>, vector<8x128xf32>,
    %c121_i32 = arith.constant 121 : i32
    %410 = tpu.dynamic_rotate %3 by %c121_i32 dim 1 : vector<8x128xf32>, i32 -> vector<8x128xf32>
    %c7_i32_146 = arith.constant 7 : i32
    %411 = vector.broadcast %c7_i32_146 : i32 to vector<1x128xi32>
    %412 = arith.addi %20, %411 : vector<1x128xi32>
    %c0_i32_147 = arith.constant 0 : i32
    %413 = vector.broadcast %c0_i32_147 : i32 to vector<1x128xi32>
    %414 = arith.cmpi sge, %412, %413 : vector<1x128xi32>
    %c7_i32_148 = arith.constant 7 : i32
    %415 = vector.broadcast %c7_i32_148 : i32 to vector<1x128xi32>
    %416 = arith.addi %20, %415 : vector<1x128xi32>
    %c16_i32_149 = arith.constant 16 : i32
    %417 = vector.broadcast %c16_i32_149 : i32 to vector<1x128xi32>
    %418 = arith.cmpi slt, %416, %417 : vector<1x128xi32>
    %419 = arith.andi %414, %418 : vector<1x128xi1>
    %cst_150 = arith.constant 0.000000e+00 : f32
    %420 = vector.shape_cast %419 : vector<1x128xi1> to vector<1x128xi1>
    %421 = vector.broadcast %420 : vector<1x128xi1> to vector<8x128xi1>
    %422 = vector.broadcast %cst_150 : f32 to vector<8x128xf32>
    %423 = arith.select %421, %410, %422 : vector<8x128xi1>, vector<8x128xf32>
    %c208 = arith.constant 208 : index
    %c0_151 = arith.constant 0 : index
    %424 = vector.load %arg6[%c208, %c0_151] : memref<344x128xf32, #tpu.memory_space<vmem>>, vector<8x128xf32>
    tpu.vector_store %arg6[%c208, %c0_151], %423 {strides = array<i32>} : memref<344x128xf32, #tpu.memory_space<vmem>>, vector<8x128xf32>,
    %c120_i32 = arith.constant 120 : i32
    %425 = tpu.dynamic_rotate %3 by %c120_i32 dim 1 : vector<8x128xf32>, i32 -> vector<8x128xf32>
    %c8_i32_152 = arith.constant 8 : i32
    %426 = vector.broadcast %c8_i32_152 : i32 to vector<1x128xi32>
    %427 = arith.addi %20, %426 : vector<1x128xi32>
    %c0_i32_153 = arith.constant 0 : i32
    %428 = vector.broadcast %c0_i32_153 : i32 to vector<1x128xi32>
    %429 = arith.cmpi sge, %427, %428 : vector<1x128xi32>
    %c8_i32_154 = arith.constant 8 : i32
    %430 = vector.broadcast %c8_i32_154 : i32 to vector<1x128xi32>
    %431 = arith.addi %20, %430 : vector<1x128xi32>
    %c16_i32_155 = arith.constant 16 : i32
    %432 = vector.broadcast %c16_i32_155 : i32 to vector<1x128xi32>
    %433 = arith.cmpi slt, %431, %432 : vector<1x128xi32>
    %434 = arith.andi %429, %433 : vector<1x128xi1>
    %cst_156 = arith.constant 0.000000e+00 : f32
    %435 = vector.shape_cast %434 : vector<1x128xi1> to vector<1x128xi1>
    %436 = vector.broadcast %435 : vector<1x128xi1> to vector<8x128xi1>
    %437 = vector.broadcast %cst_156 : f32 to vector<8x128xf32>
    %438 = arith.select %436, %425, %437 : vector<8x128xi1>, vector<8x128xf32>
    %c216 = arith.constant 216 : index
    %c0_157 = arith.constant 0 : index
    %439 = vector.load %arg6[%c216, %c0_157] : memref<344x128xf32, #tpu.memory_space<vmem>>, vector<8x128xf32>
    tpu.vector_store %arg6[%c216, %c0_157], %438 {strides = array<i32>} : memref<344x128xf32, #tpu.memory_space<vmem>>, vector<8x128xf32>,
    %c119_i32 = arith.constant 119 : i32
    %440 = tpu.dynamic_rotate %3 by %c119_i32 dim 1 : vector<8x128xf32>, i32 -> vector<8x128xf32>
    %c9_i32_158 = arith.constant 9 : i32
    %441 = vector.broadcast %c9_i32_158 : i32 to vector<1x128xi32>
    %442 = arith.addi %20, %441 : vector<1x128xi32>
    %c0_i32_159 = arith.constant 0 : i32
    %443 = vector.broadcast %c0_i32_159 : i32 to vector<1x128xi32>
    %444 = arith.cmpi sge, %442, %443 : vector<1x128xi32>
    %c9_i32_160 = arith.constant 9 : i32
    %445 = vector.broadcast %c9_i32_160 : i32 to vector<1x128xi32>
    %446 = arith.addi %20, %445 : vector<1x128xi32>
    %c16_i32_161 = arith.constant 16 : i32
    %447 = vector.broadcast %c16_i32_161 : i32 to vector<1x128xi32>
    %448 = arith.cmpi slt, %446, %447 : vector<1x128xi32>
    %449 = arith.andi %444, %448 : vector<1x128xi1>
    %cst_162 = arith.constant 0.000000e+00 : f32
    %450 = vector.shape_cast %449 : vector<1x128xi1> to vector<1x128xi1>
    %451 = vector.broadcast %450 : vector<1x128xi1> to vector<8x128xi1>
    %452 = vector.broadcast %cst_162 : f32 to vector<8x128xf32>
    %453 = arith.select %451, %440, %452 : vector<8x128xi1>, vector<8x128xf32>
    %c224 = arith.constant 224 : index
    %c0_163 = arith.constant 0 : index
    %454 = vector.load %arg6[%c224, %c0_163] : memref<344x128xf32, #tpu.memory_space<vmem>>, vector<8x128xf32>
    tpu.vector_store %arg6[%c224, %c0_163], %453 {strides = array<i32>} : memref<344x128xf32, #tpu.memory_space<vmem>>, vector<8x128xf32>,
    %c118_i32 = arith.constant 118 : i32
    %455 = tpu.dynamic_rotate %3 by %c118_i32 dim 1 : vector<8x128xf32>, i32 -> vector<8x128xf32>
    %c10_i32_164 = arith.constant 10 : i32
    %456 = vector.broadcast %c10_i32_164 : i32 to vector<1x128xi32>
    %457 = arith.addi %20, %456 : vector<1x128xi32>
    %c0_i32_165 = arith.constant 0 : i32
    %458 = vector.broadcast %c0_i32_165 : i32 to vector<1x128xi32>
    %459 = arith.cmpi sge, %457, %458 : vector<1x128xi32>
    %c10_i32_166 = arith.constant 10 : i32
    %460 = vector.broadcast %c10_i32_166 : i32 to vector<1x128xi32>
    %461 = arith.addi %20, %460 : vector<1x128xi32>
    %c16_i32_167 = arith.constant 16 : i32
    %462 = vector.broadcast %c16_i32_167 : i32 to vector<1x128xi32>
    %463 = arith.cmpi slt, %461, %462 : vector<1x128xi32>
    %464 = arith.andi %459, %463 : vector<1x128xi1>
    %cst_168 = arith.constant 0.000000e+00 : f32
    %465 = vector.shape_cast %464 : vector<1x128xi1> to vector<1x128xi1>
    %466 = vector.broadcast %465 : vector<1x128xi1> to vector<8x128xi1>
    %467 = vector.broadcast %cst_168 : f32 to vector<8x128xf32>
    %468 = arith.select %466, %455, %467 : vector<8x128xi1>, vector<8x128xf32>
    %c232 = arith.constant 232 : index
    %c0_169 = arith.constant 0 : index
    %469 = vector.load %arg6[%c232, %c0_169] : memref<344x128xf32, #tpu.memory_space<vmem>>, vector<8x128xf32>
    tpu.vector_store %arg6[%c232, %c0_169], %468 {strides = array<i32>} : memref<344x128xf32, #tpu.memory_space<vmem>>, vector<8x128xf32>,
    %c117_i32 = arith.constant 117 : i32
    %470 = tpu.dynamic_rotate %3 by %c117_i32 dim 1 : vector<8x128xf32>, i32 -> vector<8x128xf32>
    %c11_i32_170 = arith.constant 11 : i32
    %471 = vector.broadcast %c11_i32_170 : i32 to vector<1x128xi32>
    %472 = arith.addi %20, %471 : vector<1x128xi32>
    %c0_i32_171 = arith.constant 0 : i32
    %473 = vector.broadcast %c0_i32_171 : i32 to vector<1x128xi32>
    %474 = arith.cmpi sge, %472, %473 : vector<1x128xi32>
    %c11_i32_172 = arith.constant 11 : i32
    %475 = vector.broadcast %c11_i32_172 : i32 to vector<1x128xi32>
    %476 = arith.addi %20, %475 : vector<1x128xi32>
    %c16_i32_173 = arith.constant 16 : i32
    %477 = vector.broadcast %c16_i32_173 : i32 to vector<1x128xi32>
    %478 = arith.cmpi slt, %476, %477 : vector<1x128xi32>
    %479 = arith.andi %474, %478 : vector<1x128xi1>
    %cst_174 = arith.constant 0.000000e+00 : f32
    %480 = vector.shape_cast %479 : vector<1x128xi1> to vector<1x128xi1>
    %481 = vector.broadcast %480 : vector<1x128xi1> to vector<8x128xi1>
    %482 = vector.broadcast %cst_174 : f32 to vector<8x128xf32>
    %483 = arith.select %481, %470, %482 : vector<8x128xi1>, vector<8x128xf32>
    %c240 = arith.constant 240 : index
    %c0_175 = arith.constant 0 : index
    %484 = vector.load %arg6[%c240, %c0_175] : memref<344x128xf32, #tpu.memory_space<vmem>>, vector<8x128xf32>
    tpu.vector_store %arg6[%c240, %c0_175], %483 {strides = array<i32>} : memref<344x128xf32, #tpu.memory_space<vmem>>, vector<8x128xf32>,
    %c116_i32 = arith.constant 116 : i32
    %485 = tpu.dynamic_rotate %3 by %c116_i32 dim 1 : vector<8x128xf32>, i32 -> vector<8x128xf32>
    %c12_i32_176 = arith.constant 12 : i32
    %486 = vector.broadcast %c12_i32_176 : i32 to vector<1x128xi32>
    %487 = arith.addi %20, %486 : vector<1x128xi32>
    %c0_i32_177 = arith.constant 0 : i32
    %488 = vector.broadcast %c0_i32_177 : i32 to vector<1x128xi32>
    %489 = arith.cmpi sge, %487, %488 : vector<1x128xi32>
    %c12_i32_178 = arith.constant 12 : i32
    %490 = vector.broadcast %c12_i32_178 : i32 to vector<1x128xi32>
    %491 = arith.addi %20, %490 : vector<1x128xi32>
    %c16_i32_179 = arith.constant 16 : i32
    %492 = vector.broadcast %c16_i32_179 : i32 to vector<1x128xi32>
    %493 = arith.cmpi slt, %491, %492 : vector<1x128xi32>
    %494 = arith.andi %489, %493 : vector<1x128xi1>
    %cst_180 = arith.constant 0.000000e+00 : f32
    %495 = vector.shape_cast %494 : vector<1x128xi1> to vector<1x128xi1>
    %496 = vector.broadcast %495 : vector<1x128xi1> to vector<8x128xi1>
    %497 = vector.broadcast %cst_180 : f32 to vector<8x128xf32>
    %498 = arith.select %496, %485, %497 : vector<8x128xi1>, vector<8x128xf32>
    %c248 = arith.constant 248 : index
    %c0_181 = arith.constant 0 : index
    %499 = vector.load %arg6[%c248, %c0_181] : memref<344x128xf32, #tpu.memory_space<vmem>>, vector<8x128xf32>
    tpu.vector_store %arg6[%c248, %c0_181], %498 {strides = array<i32>} : memref<344x128xf32, #tpu.memory_space<vmem>>, vector<8x128xf32>,
    %c115_i32 = arith.constant 115 : i32
    %500 = tpu.dynamic_rotate %3 by %c115_i32 dim 1 : vector<8x128xf32>, i32 -> vector<8x128xf32>
    %c13_i32_182 = arith.constant 13 : i32
    %501 = vector.broadcast %c13_i32_182 : i32 to vector<1x128xi32>
    %502 = arith.addi %20, %501 : vector<1x128xi32>
    %c0_i32_183 = arith.constant 0 : i32
    %503 = vector.broadcast %c0_i32_183 : i32 to vector<1x128xi32>
    %504 = arith.cmpi sge, %502, %503 : vector<1x128xi32>
    %c13_i32_184 = arith.constant 13 : i32
    %505 = vector.broadcast %c13_i32_184 : i32 to vector<1x128xi32>
    %506 = arith.addi %20, %505 : vector<1x128xi32>
    %c16_i32_185 = arith.constant 16 : i32
    %507 = vector.broadcast %c16_i32_185 : i32 to vector<1x128xi32>
    %508 = arith.cmpi slt, %506, %507 : vector<1x128xi32>
    %509 = arith.andi %504, %508 : vector<1x128xi1>
    %cst_186 = arith.constant 0.000000e+00 : f32
    %510 = vector.shape_cast %509 : vector<1x128xi1> to vector<1x128xi1>
    %511 = vector.broadcast %510 : vector<1x128xi1> to vector<8x128xi1>
    %512 = vector.broadcast %cst_186 : f32 to vector<8x128xf32>
    %513 = arith.select %511, %500, %512 : vector<8x128xi1>, vector<8x128xf32>
    %c256 = arith.constant 256 : index
    %c0_187 = arith.constant 0 : index
    %514 = vector.load %arg6[%c256, %c0_187] : memref<344x128xf32, #tpu.memory_space<vmem>>, vector<8x128xf32>
    tpu.vector_store %arg6[%c256, %c0_187], %513 {strides = array<i32>} : memref<344x128xf32, #tpu.memory_space<vmem>>, vector<8x128xf32>,
    %c114_i32 = arith.constant 114 : i32
    %515 = tpu.dynamic_rotate %3 by %c114_i32 dim 1 : vector<8x128xf32>, i32 -> vector<8x128xf32>
    %c14_i32_188 = arith.constant 14 : i32
    %516 = vector.broadcast %c14_i32_188 : i32 to vector<1x128xi32>
    %517 = arith.addi %20, %516 : vector<1x128xi32>
    %c0_i32_189 = arith.constant 0 : i32
    %518 = vector.broadcast %c0_i32_189 : i32 to vector<1x128xi32>
    %519 = arith.cmpi sge, %517, %518 : vector<1x128xi32>
    %c14_i32_190 = arith.constant 14 : i32
    %520 = vector.broadcast %c14_i32_190 : i32 to vector<1x128xi32>
    %521 = arith.addi %20, %520 : vector<1x128xi32>
    %c16_i32_191 = arith.constant 16 : i32
    %522 = vector.broadcast %c16_i32_191 : i32 to vector<1x128xi32>
    %523 = arith.cmpi slt, %521, %522 : vector<1x128xi32>
    %524 = arith.andi %519, %523 : vector<1x128xi1>
    %cst_192 = arith.constant 0.000000e+00 : f32
    %525 = vector.shape_cast %524 : vector<1x128xi1> to vector<1x128xi1>
    %526 = vector.broadcast %525 : vector<1x128xi1> to vector<8x128xi1>
    %527 = vector.broadcast %cst_192 : f32 to vector<8x128xf32>
    %528 = arith.select %526, %515, %527 : vector<8x128xi1>, vector<8x128xf32>
    %c264 = arith.constant 264 : index
    %c0_193 = arith.constant 0 : index
    %529 = vector.load %arg6[%c264, %c0_193] : memref<344x128xf32, #tpu.memory_space<vmem>>, vector<8x128xf32>
    tpu.vector_store %arg6[%c264, %c0_193], %528 {strides = array<i32>} : memref<344x128xf32, #tpu.memory_space<vmem>>, vector<8x128xf32>,
    %c113_i32 = arith.constant 113 : i32
    %530 = tpu.dynamic_rotate %3 by %c113_i32 dim 1 : vector<8x128xf32>, i32 -> vector<8x128xf32>
    %c15_i32_194 = arith.constant 15 : i32
    %531 = vector.broadcast %c15_i32_194 : i32 to vector<1x128xi32>
    %532 = arith.addi %20, %531 : vector<1x128xi32>
    %c0_i32_195 = arith.constant 0 : i32
    %533 = vector.broadcast %c0_i32_195 : i32 to vector<1x128xi32>
    %534 = arith.cmpi sge, %532, %533 : vector<1x128xi32>
    %c15_i32_196 = arith.constant 15 : i32
    %535 = vector.broadcast %c15_i32_196 : i32 to vector<1x128xi32>
    %536 = arith.addi %20, %535 : vector<1x128xi32>
    %c16_i32_197 = arith.constant 16 : i32
    %537 = vector.broadcast %c16_i32_197 : i32 to vector<1x128xi32>
    %538 = arith.cmpi slt, %536, %537 : vector<1x128xi32>
    %539 = arith.andi %534, %538 : vector<1x128xi1>
    %cst_198 = arith.constant 0.000000e+00 : f32
    %540 = vector.shape_cast %539 : vector<1x128xi1> to vector<1x128xi1>
    %541 = vector.broadcast %540 : vector<1x128xi1> to vector<8x128xi1>
    %542 = vector.broadcast %cst_198 : f32 to vector<8x128xf32>
    %543 = arith.select %541, %530, %542 : vector<8x128xi1>, vector<8x128xf32>
    %c272 = arith.constant 272 : index
    %c0_199 = arith.constant 0 : index
    %544 = vector.load %arg6[%c272, %c0_199] : memref<344x128xf32, #tpu.memory_space<vmem>>, vector<8x128xf32>
    tpu.vector_store %arg6[%c272, %c0_199], %543 {strides = array<i32>} : memref<344x128xf32, #tpu.memory_space<vmem>>, vector<8x128xf32>,
    %c112_i32 = arith.constant 112 : i32
    %545 = tpu.dynamic_rotate %3 by %c112_i32 dim 1 : vector<8x128xf32>, i32 -> vector<8x128xf32>
    %c16_i32_200 = arith.constant 16 : i32
    %546 = vector.broadcast %c16_i32_200 : i32 to vector<1x128xi32>
    %547 = arith.addi %20, %546 : vector<1x128xi32>
    %c0_i32_201 = arith.constant 0 : i32
    %548 = vector.broadcast %c0_i32_201 : i32 to vector<1x128xi32>
    %549 = arith.cmpi sge, %547, %548 : vector<1x128xi32>
    %c16_i32_202 = arith.constant 16 : i32
    %550 = vector.broadcast %c16_i32_202 : i32 to vector<1x128xi32>
    %551 = arith.addi %20, %550 : vector<1x128xi32>
    %c16_i32_203 = arith.constant 16 : i32
    %552 = vector.broadcast %c16_i32_203 : i32 to vector<1x128xi32>
    %553 = arith.cmpi slt, %551, %552 : vector<1x128xi32>
    %554 = arith.andi %549, %553 : vector<1x128xi1>
    %cst_204 = arith.constant 0.000000e+00 : f32
    %555 = vector.shape_cast %554 : vector<1x128xi1> to vector<1x128xi1>
    %556 = vector.broadcast %555 : vector<1x128xi1> to vector<8x128xi1>
    %557 = vector.broadcast %cst_204 : f32 to vector<8x128xf32>
    %558 = arith.select %556, %545, %557 : vector<8x128xi1>, vector<8x128xf32>
    %c280 = arith.constant 280 : index
    %c0_205 = arith.constant 0 : index
    %559 = vector.load %arg6[%c280, %c0_205] : memref<344x128xf32, #tpu.memory_space<vmem>>, vector<8x128xf32>
    tpu.vector_store %arg6[%c280, %c0_205], %558 {strides = array<i32>} : memref<344x128xf32, #tpu.memory_space<vmem>>, vector<8x128xf32>,
    %c111_i32 = arith.constant 111 : i32
    %560 = tpu.dynamic_rotate %3 by %c111_i32 dim 1 : vector<8x128xf32>, i32 -> vector<8x128xf32>
    %c17_i32_206 = arith.constant 17 : i32
    %561 = vector.broadcast %c17_i32_206 : i32 to vector<1x128xi32>
    %562 = arith.addi %20, %561 : vector<1x128xi32>
    %c0_i32_207 = arith.constant 0 : i32
    %563 = vector.broadcast %c0_i32_207 : i32 to vector<1x128xi32>
    %564 = arith.cmpi sge, %562, %563 : vector<1x128xi32>
    %c17_i32_208 = arith.constant 17 : i32
    %565 = vector.broadcast %c17_i32_208 : i32 to vector<1x128xi32>
    %566 = arith.addi %20, %565 : vector<1x128xi32>
    %c16_i32_209 = arith.constant 16 : i32
    %567 = vector.broadcast %c16_i32_209 : i32 to vector<1x128xi32>
    %568 = arith.cmpi slt, %566, %567 : vector<1x128xi32>
    %569 = arith.andi %564, %568 : vector<1x128xi1>
    %cst_210 = arith.constant 0.000000e+00 : f32
    %570 = vector.shape_cast %569 : vector<1x128xi1> to vector<1x128xi1>
    %571 = vector.broadcast %570 : vector<1x128xi1> to vector<8x128xi1>
    %572 = vector.broadcast %cst_210 : f32 to vector<8x128xf32>
    %573 = arith.select %571, %560, %572 : vector<8x128xi1>, vector<8x128xf32>
    %c288 = arith.constant 288 : index
    %c0_211 = arith.constant 0 : index
    %574 = vector.load %arg6[%c288, %c0_211] : memref<344x128xf32, #tpu.memory_space<vmem>>, vector<8x128xf32>
    tpu.vector_store %arg6[%c288, %c0_211], %573 {strides = array<i32>} : memref<344x128xf32, #tpu.memory_space<vmem>>, vector<8x128xf32>,
    %c110_i32 = arith.constant 110 : i32
    %575 = tpu.dynamic_rotate %3 by %c110_i32 dim 1 : vector<8x128xf32>, i32 -> vector<8x128xf32>
    %c18_i32_212 = arith.constant 18 : i32
    %576 = vector.broadcast %c18_i32_212 : i32 to vector<1x128xi32>
    %577 = arith.addi %20, %576 : vector<1x128xi32>
    %c0_i32_213 = arith.constant 0 : i32
    %578 = vector.broadcast %c0_i32_213 : i32 to vector<1x128xi32>
    %579 = arith.cmpi sge, %577, %578 : vector<1x128xi32>
    %c18_i32_214 = arith.constant 18 : i32
    %580 = vector.broadcast %c18_i32_214 : i32 to vector<1x128xi32>
    %581 = arith.addi %20, %580 : vector<1x128xi32>
    %c16_i32_215 = arith.constant 16 : i32
    %582 = vector.broadcast %c16_i32_215 : i32 to vector<1x128xi32>
    %583 = arith.cmpi slt, %581, %582 : vector<1x128xi32>
    %584 = arith.andi %579, %583 : vector<1x128xi1>
    %cst_216 = arith.constant 0.000000e+00 : f32
    %585 = vector.shape_cast %584 : vector<1x128xi1> to vector<1x128xi1>
    %586 = vector.broadcast %585 : vector<1x128xi1> to vector<8x128xi1>
    %587 = vector.broadcast %cst_216 : f32 to vector<8x128xf32>
    %588 = arith.select %586, %575, %587 : vector<8x128xi1>, vector<8x128xf32>
    %c296 = arith.constant 296 : index
    %c0_217 = arith.constant 0 : index
    %589 = vector.load %arg6[%c296, %c0_217] : memref<344x128xf32, #tpu.memory_space<vmem>>, vector<8x128xf32>
    tpu.vector_store %arg6[%c296, %c0_217], %588 {strides = array<i32>} : memref<344x128xf32, #tpu.memory_space<vmem>>, vector<8x128xf32>,
    %c109_i32 = arith.constant 109 : i32
    %590 = tpu.dynamic_rotate %3 by %c109_i32 dim 1 : vector<8x128xf32>, i32 -> vector<8x128xf32>
    %c19_i32_218 = arith.constant 19 : i32
    %591 = vector.broadcast %c19_i32_218 : i32 to vector<1x128xi32>
    %592 = arith.addi %20, %591 : vector<1x128xi32>
    %c0_i32_219 = arith.constant 0 : i32
    %593 = vector.broadcast %c0_i32_219 : i32 to vector<1x128xi32>
    %594 = arith.cmpi sge, %592, %593 : vector<1x128xi32>
    %c19_i32_220 = arith.constant 19 : i32
    %595 = vector.broadcast %c19_i32_220 : i32 to vector<1x128xi32>
    %596 = arith.addi %20, %595 : vector<1x128xi32>
    %c16_i32_221 = arith.constant 16 : i32
    %597 = vector.broadcast %c16_i32_221 : i32 to vector<1x128xi32>
    %598 = arith.cmpi slt, %596, %597 : vector<1x128xi32>
    %599 = arith.andi %594, %598 : vector<1x128xi1>
    %cst_222 = arith.constant 0.000000e+00 : f32
    %600 = vector.shape_cast %599 : vector<1x128xi1> to vector<1x128xi1>
    %601 = vector.broadcast %600 : vector<1x128xi1> to vector<8x128xi1>
    %602 = vector.broadcast %cst_222 : f32 to vector<8x128xf32>
    %603 = arith.select %601, %590, %602 : vector<8x128xi1>, vector<8x128xf32>
    %c304 = arith.constant 304 : index
    %c0_223 = arith.constant 0 : index
    %604 = vector.load %arg6[%c304, %c0_223] : memref<344x128xf32, #tpu.memory_space<vmem>>, vector<8x128xf32>
    tpu.vector_store %arg6[%c304, %c0_223], %603 {strides = array<i32>} : memref<344x128xf32, #tpu.memory_space<vmem>>, vector<8x128xf32>,
    %c1_i32_224 = arith.constant 1 : i32
    %605 = vector.broadcast %c1_i32_224 : i32 to vector<1x128xi32>
    %606 = arith.cmpi sge, %20, %605 : vector<1x128xi32>
    %c1_i32_225 = arith.constant 1 : i32
    %607 = tpu.dynamic_rotate %0 by %c1_i32_225 dim 1 : vector<32x128xf32>, i32 -> vector<32x128xf32>
    %cst_226 = arith.constant -3.40282347E+38 : f32
    %608 = vector.shape_cast %606 : vector<1x128xi1> to vector<1x128xi1>
    %609 = vector.broadcast %608 : vector<1x128xi1> to vector<32x128xi1>
    %610 = vector.broadcast %cst_226 : f32 to vector<32x128xf32>
    %611 = arith.select %609, %607, %610 : vector<32x128xi1>, vector<32x128xf32>
    %c14_i32_227 = arith.constant 14 : i32
    %612 = vector.broadcast %c14_i32_227 : i32 to vector<1x128xi32>
    %613 = arith.cmpi sle, %20, %612 : vector<1x128xi32>
    %c127_i32_228 = arith.constant 127 : i32
    %614 = tpu.dynamic_rotate %0 by %c127_i32_228 dim 1 : vector<32x128xf32>, i32 -> vector<32x128xf32>
    %cst_229 = arith.constant -3.40282347E+38 : f32
    %615 = vector.shape_cast %613 : vector<1x128xi1> to vector<1x128xi1>
    %616 = vector.broadcast %615 : vector<1x128xi1> to vector<32x128xi1>
    %617 = vector.broadcast %cst_229 : f32 to vector<32x128xf32>
    %618 = arith.select %616, %614, %617 : vector<32x128xi1>, vector<32x128xf32>
    %619 = arith.maximumf %0, %611 : vector<32x128xf32>
    %620 = arith.maximumf %619, %618 : vector<32x128xf32>
    %c312 = arith.constant 312 : index
    %c0_230 = arith.constant 0 : index
    %621 = vector.load %arg6[%c312, %c0_230] : memref<344x128xf32, #tpu.memory_space<vmem>>, vector<32x128xf32>
    tpu.vector_store %arg6[%c312, %c0_230], %620 {strides = array<i32>} : memref<344x128xf32, #tpu.memory_space<vmem>>, vector<32x128xf32>,
    %c0_231 = arith.constant 0 : index
    %c0_232 = arith.constant 0 : index
    %622 = vector.load %arg3[%c0_231, %c0_232] : memref<32x344xbf16, #tpu.memory_space<vmem>>, vector<32x344xbf16>
    %c0_233 = arith.constant 0 : index
    %c0_234 = arith.constant 0 : index
    %623 = vector.load %arg6[%c0_233, %c0_234] : memref<344x128xf32, #tpu.memory_space<vmem>>, vector<344x128xf32>
    %624 = arith.truncf %623 : vector<344x128xf32> to vector<344x128xbf16>
    %cst_235 = arith.constant dense<0.000000e+00> : vector<32x128xf32>
    %625 = tpu.matmul %622, %624, %cst_235 {dimension_numbers = #tpu.dot_dimension_numbers<[1], [0], [0], [1], [0, 0, 1, 1], [], []>} : vector<32x344xbf16>, vector<344x128xbf16>, vector<32x128xf32> -> vector<32x128xf32>
    %c0_236 = arith.constant 0 : index
    %c0_237 = arith.constant 0 : index
    %c0_238 = arith.constant 0 : index
    %626 = vector.load %arg4[%c0_236, %c0_237, %c0_238] : memref<3x32x1xf32, #tpu.memory_space<vmem>>, vector<1x32x1xf32>
    %627 = vector.shape_cast %626 : vector<1x32x1xf32> to vector<32x1xf32>
    %628 = vector.broadcast %627 : vector<32x1xf32> to vector<32x128xf32>
    %629 = arith.addf %625, %628 : vector<32x128xf32>
    %cst_239 = arith.constant 0.000000e+00 : f32
    %630 = vector.broadcast %cst_239 : f32 to vector<32x128xf32>
    %631 = arith.maximumf %629, %630 : vector<32x128xf32>
    %632 = arith.addf %0, %631 : vector<32x128xf32>
    %c1 = arith.constant 1 : index
    %c0_240 = arith.constant 0 : index
    %c0_241 = arith.constant 0 : index
    %633 = vector.load %arg4[%c1, %c0_240, %c0_241] : memref<3x32x1xf32, #tpu.memory_space<vmem>>, vector<1x32x1xf32>
    %634 = vector.shape_cast %633 : vector<1x32x1xf32> to vector<32x1xf32>
    %635 = vector.broadcast %634 : vector<32x1xf32> to vector<32x128xf32>
    %636 = arith.mulf %632, %635 : vector<32x128xf32>
    %c2 = arith.constant 2 : index
    %c0_242 = arith.constant 0 : index
    %c0_243 = arith.constant 0 : index
    %637 = vector.load %arg4[%c2, %c0_242, %c0_243] : memref<3x32x1xf32, #tpu.memory_space<vmem>>, vector<1x32x1xf32>
    %638 = vector.shape_cast %637 : vector<1x32x1xf32> to vector<32x1xf32>
    %639 = vector.broadcast %638 : vector<32x1xf32> to vector<32x128xf32>
    %640 = arith.addf %636, %639 : vector<32x128xf32>
    %c0_244 = arith.constant 0 : index
    %c0_245 = arith.constant 0 : index
    %641 = vector.load %arg5[%c0_244, %c0_245] : memref<32x128xf32, #tpu.memory_space<vmem>>, vector<32x128xf32>
    tpu.vector_store %arg5[%c0_244, %c0_245], %640 {strides = array<i32>} : memref<32x128xf32, #tpu.memory_space<vmem>>, vector<32x128xf32>,
    return
  }
  func.func @transform_0(%arg0: i32) -> (i32, i32) {
    %c0_i32 = arith.constant 0 : i32
    %c0_i32_0 = arith.constant 0 : i32
    return %c0_i32, %arg0 : i32, i32
  }
  func.func @transform_1(%arg0: i32) -> (i32, i32) {
    %c0_i32 = arith.constant 0 : i32
    %c0_i32_0 = arith.constant 0 : i32
    %c0_i32_1 = arith.constant 0 : i32
    return %c0_i32, %c0_i32_0 : i32, i32
  }
  func.func @transform_2(%arg0: i32) -> (i32, i32) {
    %c0_i32 = arith.constant 0 : i32
    %c0_i32_0 = arith.constant 0 : i32
    %c0_i32_1 = arith.constant 0 : i32
    return %c0_i32, %c0_i32_0 : i32, i32
  }
  func.func @transform_3(%arg0: i32) -> (i32, i32, i32) {
    %c0_i32 = arith.constant 0 : i32
    %c0_i32_0 = arith.constant 0 : i32
    %c0_i32_1 = arith.constant 0 : i32
    %c0_i32_2 = arith.constant 0 : i32
    return %c0_i32, %c0_i32_0, %c0_i32_1 : i32, i32, i32
  }
  func.func @transform_4(%arg0: i32) -> (i32, i32) {
    %c0_i32 = arith.constant 0 : i32
    %c0_i32_0 = arith.constant 0 : i32
    return %c0_i32, %arg0 : i32, i32
  }
}

</mosaic_0001>

<bundles_post_ra>
// kernel: tpu_custom_call.1
= control target key start
LH: loop header
LB: loop body
LE: loop exit
PB: predicated region body
PF: predicated region fallthrough
CT: control target
= control target key end

     0   :  { %9 = vsyncpa [#allocation5], 0  ;;  %s1902_s0 = inlined_call_operand.vmem [shape: f32[32,256], index: 0, kind: input, shape index: {}]   ;;  %s1903_s1 = inlined_call_operand.vmem [shape: bf16[8,32], index: 1, kind: input, shape index: {}]   ;;  %s1904_s2 = inlined_call_operand.hbm [shape: bf16[32,344], index: 2, kind: input, shape index: {}]   ;;  %s1905_s3 = inlined_call_operand.vmem [shape: f32[3,32,1], index: 3, kind: input, shape index: {}]   ;;  %s1906_s4 = inlined_call_operand.hbm [shape: f32[32,256], index: 4, kind: output, shape index: {}]  }
   0x1   :  { %10 = vsyncpa [#allocation6], 0 }
   0x2   :  { %12 = vsyncpa [#allocation6 + $0x1], 0  ;;  %s1565_s15 = smov 0   ;;  %s1567_s16 = smov 0  }
   0x3   :  { %s1569_s17 = smov 0   ;;  %s1571_s18 = smov 0  }
   0x4 LB: > { %s1586_s19 = sadd.s32 4294967295, %s1497_s18   ;;  %s1151_s20 = sadd.s32 4294967294, %s1497_s18   ;;  %s1497_s18 = sphi %s1571_s18, %s1924_s18   ;;  %s1493_s17 = sphi %s1569_s17, %s1923_s17   ;;  %s1489_s16 = sphi %s1567_s16, %s1922_s16   ;;  %s1485_s15 = sphi %s1565_s15, %s1921_s15  }
   0x5   : > { %s1590_s21 = sadd.s32 1, %s1497_s18   ;;  %s25_s22 = sadd.s32 1, %s1493_s17 }
   0x6   : > { %s22_s23 = ssub.s32 %s1497_s18, %s1590_s21  ;;  %p32_p0 = scmp.ne.s32.totalorder %s1493_s17, %s1489_s16 }
   0x7   : > { %p23_p1 = scmp.eq.s32.totalorder %s22_s23, 0  ;;  %p33_p2 = scmp.eq.s32.totalorder %s1497_s18, 0 }
   0x8   : > { %p125_p3 = scmp.eq.s32.totalorder %s1586_s19, 1  ;;  %p130_p4 = scmp.ne.s32.totalorder %s1489_s16, %s1485_s15 }
   0x9   : > { %s1602_s24 = scalar_select %p23_p1, %s1493_s17, %s25_s22  }
   0xa   : > { %p1604_p5 = por %p33_p2, %p32_p0  ;;  %p1608_p6 = por %p125_p3, %p32_p0 }
   0xb   : > { %p131_p7 = scmp.eq.s32.totalorder %s1151_s20, 1  ;;  %p1152_p8 = scmp.ge.s32.totalorder %s1497_s18, 1 }
   0xc   : > { %s1910_s25 = scalar_select %p1604_p5, 1, 0 }
   0xd   : > { %s1911_s26 = scalar_select %p1608_p6, 1, 0 }
   0xe   : > { %p138_p9 = scmp.lt.s32.totalorder %s1497_s18, 3  ;;  %p1614_p10 = por %p131_p7, %p130_p4 }
   0xf   : > { %p1907_p11 = scmp.eq.s32.totalorder %s1586_s19, 0  ;;  %s1499_s29 = smov [#allocation4]  }
  0x10   : > { %s1912_s27 = scalar_select %p1614_p10, 1, 0 }
  0x11   : > { %p1619_p12 = pnand %p1152_p8, %p138_p9  ;;  %s153_s30 = sshll.u32 %s1499_s29, 4  ;;  %s154_s30 = int_to_ptr.vmem [resolvable:$true] %s153_s30 }
  0x12   : > { %s1403_s8 = scalar_lea.hbm %s1904_s2, 768 }
  0x13   : > { %s1913_s28 = scalar_select %p1619_p12, 1, 0 }
  0x14   : > { %p1300_p13 = pneg %p1619_p12  ;;  %p1404_p1 = scmp.ne.s32.totalorder %s1904_s2, %s1403_s8 }
  0x15   : > { %p1410_p7 = scmp.lt.u32.totalorder %s1403_s8, %s1904_s2 }
  0x16   : > { %p1627_p0 = pnand %p1907_p11, %p1300_p13 }
  0x18   : > { %p1405_p2 = pneg %p1627_p0 }
  0x1a   : > { %p1406_p3 = pnand %p1405_p2, %p1404_p1 }
  0x1c   : > { %p1407_p4 = pneg %p1406_p3 }
  0x1e   : > { %p1412_p8 = pnand %p1410_p7, %p1407_p4 }
  0x20   : > { %1415 = shalt.err (!%p1412_p8)
}
  0x21   : > { %s1416_s13 = scalar_lea.vmem %s154_s30, 768  ;;  %p1424_p10 = scmp.lt.s32.totalorder %s154_s30, %s154_s30 }
  0x22   : > { %p1417_p9 = scmp.ne.s32.totalorder %s154_s30, %s1416_s13  ;;  %p1425_p6 = scmp.lt.s32.totalorder %s1416_s13, %s1416_s13 }
  0x24   : > { %p1419_p13 = pnand %p1417_p9, %p1405_p2  ;;  %p1426_p12 = por %p1425_p6, %p1424_p10 }
  0x26   : > { %p1420_p11 = pneg %p1419_p13 }
  0x28   : > { %p1427_p5 = pnand %p1426_p12, %p1420_p11 }
  0x2a   : > { %1430 = shalt.err (!%p1427_p5)
}
  0x2b   : > { %s1500_s14 = smov 192   ;;  %s1501_s20 = smov 12  }
  0x2c   : > { %1303 = dma.hbm_to_vmem [thread:$0]  (!%p1627_p0), %s1904_s2, 768, %s154_s30, [#allocation5], %s1500_s14, %s1500_s14, %s1501_s20  }
  0x2d   : > { %p1154_p1 = scmp.ge.s32.totalorder %s1497_s18, 2 }
  0x2e   : > { %p1915_p2 = scmp.ne.s32.totalorder (!%p1154_p1), %s1910_s25, 0 }
  0x2f   : > { %166 = sbr.rel (%p1154_p1) target bundleno = 61 (0x3d), region = 28 }
  0x36   : > { %169 = sbr.rel (!%p1915_p2) target bundleno = 61 (0x3d), region = 32  ;;  %s171_s29 = sand.u32 (%p1915_p2), 1, %s1493_s17  }
  0x37   : > { %s1156_s6 = sshll.u32 (%p1915_p2), %s1497_s18, 3  ;;  %s1155_s7 = sshll.u32 (%p1915_p2), %s171_s29, 5 }
  0x38   : > { %s175_s5 = scalar_lea.vmem (%p1915_p2), %s1902_s0, %s1156_s6  ;;  %s173_s30 = scalar_lea.vmem (%p1915_p2), [#allocation3], %s1155_s7 }
  0x39   : > { %v209_v0 = vld [vmem:[%s175_s5] sm:$0xff] (%p1915_p2)  ;;  %v211_v1 = vld [vmem:[%s175_s5 + $0x10] sm:$0xff] (%p1915_p2) }
  0x3a   : > { %v213_v2 = vld [vmem:[%s175_s5 + $0x20] sm:$0xff] (%p1915_p2)  ;;  %210 = vst [vmem:[%s173_s30] sm:$0xff] (%p1915_p2), %v209_v0  ;;  %212 = vst [vmem:[%s173_s30 + $0x8] sm:$0xff] (%p1915_p2), %v211_v1  ;;  %v215_v3 = vld [vmem:[%s175_s5 + $0x30] sm:$0xff] (%p1915_p2) }
  0x3b   : > { %214 = vst [vmem:[%s173_s30 + $0x10] sm:$0xff] (%p1915_p2), %v213_v2  ;;  %216 = vst [vmem:[%s173_s30 + $0x18] sm:$0xff] (%p1915_p2), %v215_v3 }
  0x3d PF: > { %p1916_p5 = scmp.ne.s32.totalorder %s1913_s28, 0 }
  0x3e   : > { %s228_s25 = sand.u32 (!%p1916_p5), 1, %s1489_s16   ;;  %p1917_p6 = scmp.eq.s32.totalorder (!%p1916_p5), %s1586_s19, 0 }
  0x3f   : > { %225 = sbr.rel (%p1916_p5) target bundleno = 723 (0x2d3), region = 70  ;;  %s1662_s10 = sshll.u32 (!%p1916_p5), %s228_s25, 5 }
  0x40   : > { %s230_s11 = scalar_lea.vmem (!%p1916_p5), [#allocation3], %s1662_s10 }
  0x46   : > { %1476 = dma.done.wait (%p1917_p6), [#allocation5], 768   ;;  %p1918_p10 = pmov %p1917_p6 }
  0x47   : > { %v1502_v4 = vmov 0.0   ;;  %vm1503_vm0 = vmmov 0   ;;  %v1671_v5 = vld [vmem:[%s230_s11] sm:$0xff]  ;;  %v1673_v6 = vld [vmem:[%s230_s11 + $0x8] sm:$0xff]  ;;  %v1675_v7 = vld [vmem:[%s230_s11 + $0x10] sm:$0xff]  ;;  %s1504_s28 = smov 127   ;;  %v309_v33 = vlaneseq }
  0x48   : > { %1478 = vsyncadd (%p1918_p10), [#allocation5], 4294966528  ;;  %1269 = vmatprep.subr.bf16.mxu0 %v1502_v4  ;;  %1273 = vmatprep.mubr.msk.bf16.mxu0 %vm1503_vm0, %v1502_v4  ;;  %v263_v8 = vpack.c.bf16 %v1673_v6, %v1671_v5  ;;  %v1679_v9 = vld [vmem:[%s230_s11 + $0x18] sm:$0xff]  ;;  %v1383_v10 = vpack.i.bf16 %v1673_v6, %v1671_v5  ;;  %s1505_s12 = smov 1   ;;  %v262_v12 = vld [vmem:[%s1903_s1] sm:$0xf]  ;;  %v1388_v18 = vpack.i.bf16 %v1675_v7, %v1673_v6 }
  0x49   : > { %726 = vrot.lane.b32.xlu1 %v1671_v5, %s1504_s28  ;;  %v264_v11 = vpack.c.bf16 %v1679_v9, %v1675_v7  ;;  %vm265_vm1 = vcmask 261120   ;;  %s1506_s20 = smov 3   ;;  %s1507_s22 = smov 2   ;;  %v1397_v17 = vld [vmem:[#allocation4 + $0x4] ss:$12 sps:$4 sm:$0xff]   ;;  %vm879_vm2 = vcmask 719872  }
  0x4a   : > { %1270 = vmatpush3.bf16.msra.mxu0 %v263_v8  ;;  %1384 = vrot.lane.b32.xlu0 %v1383_v10, %s1505_s12  ;;  %s1508_s23 = smov 15   ;;  %s1509_s29 = smov 126   ;;  %v1401_v19 = vld [vmem:[#allocation4 + $0x8] ss:$12 sps:$4 sm:$0xff]   ;;  %v1534_v20 = vmov 0   ;;  %v825_v22 = vld [vmem:[%s1905_s3] sm:$0xff] }
  0x4b   : > { %1271 = vmatprep.subr.bf16.mxu0 %v1502_v4  ;;  %s1510_s6 = smov 125   ;;  %s1511_s7 = smov 14   ;;  %922 = vmatprep.mubr.bf16.mxu1 %v1397_v17  ;;  %v826_v21 = vld [vmem:[%s1905_s3 + $0x8] sm:$0xff]  ;;  %v827_v23 = vld [vmem:[%s1905_s3 + $0x10] sm:$0xff]  ;;  %v828_v24 = vld [vmem:[%s1905_s3 + $0x18] sm:$0xff]  ;;  %v310_v34 = vand.u32 127, %v309_v33 }
  0x4c   : > { %s1512_s8 = smov 13   ;;  %s1513_s9 = smov 124   ;;  %1394 = vset.pattern.permute.xlu1 %v1534_v20  ;;  %1393 = vset.pattern.permute.xlu0 %v1534_v20  ;;  %v1170_v25 = vld [vmem:[%s1905_s3 + $0x20] sm:$0xff]  ;;  %v1171_v26 = vld [vmem:[%s1905_s3 + $0x28] sm:$0xff]  ;;  %v1172_v27 = vld [vmem:[%s1905_s3 + $0x30] sm:$0xff]  ;;  %vm1535_vm7 = vmmov 1  }
  0x4d   : > { %s1514_s5 = smov 123   ;;  %s1515_s30 = smov 12   ;;  %v1173_v28 = vld [vmem:[%s1905_s3 + $0x38] sm:$0xff]  ;;  %v1174_v29 = vld [vmem:[%s1905_s3 + $0x40] sm:$0xff]  ;;  %v1175_v30 = vld [vmem:[%s1905_s3 + $0x48] sm:$0xff]  ;;  %v1775_v36 = vand.u32 15, %v310_v34 }
  0x4e   : > { %1272 = vmatpush3.bf16.msra.mxu0 %v264_v11  ;;  %s1516_s11 = smov 11   ;;  %s1517_s13 = smov 122   ;;  %v1176_v31 = vld [vmem:[%s1905_s3 + $0x50] sm:$0xff]  ;;  %v1177_v32 = vld [vmem:[%s1905_s3 + $0x58] sm:$0xff]  ;;  %v1536_v52 = vmov 0.0|0.0  }
  0x4f   : > { %s1518_s14 = smov 121   ;;  %v485_v38 = vadd.s32 4294967293, %v1775_v36  ;;  %v495_v39 = vadd.s32 4294967294, %v1775_v36  ;;  %v505_v40 = vadd.s32 4294967295, %v1775_v36  ;;  %v522_v43 = vadd.s32 1, %v1775_v36  ;;  %p1919_p12 = scmp.ne.s32.totalorder %s1911_s26, 0 }
  0x50   : > { %v532_v44 = vadd.s32 2, %v1775_v36  ;;  %v365_v48 = vadd.s32 4294967281, %v1775_v36  ;;  %v375_v49 = vadd.s32 4294967282, %v1775_v36  ;;  %v542_v54 = vadd.s32 3, %v1775_v36 }
  0x51   : > { %1274 = vmatmul.mubr.msk.bf16.vlgmr.msra.gmra.mrb[0].mxu0 %vm265_vm1, %v262_v12  ;;  %vm486_vm3 = vcmp.ge.s32.totalorder %v485_v38, 0  ;;  %vm496_vm4 = vcmp.ge.s32.totalorder %v495_v39, 0  ;;  %vm506_vm5 = vcmp.ge.s32.totalorder %v505_v40, 0  ;;  %vm524_vm9 = vcmp.lt.s32.totalorder %v522_v43, 16 }
  0x52   : > { %1289 = vmatprep.mubr.msk.bf16.mxu0 %vm879_vm2, %v1401_v19  ;;  %vm1200_vm6 = vmpackc.low %vm496_vm4, %vm486_vm3  ;;  %vm534_vm10 = vcmp.lt.s32.totalorder %v532_v44, 16  ;;  %v552_v55 = vadd.s32 4, %v1775_v36  ;;  %vm366_vm12 = vcmp.ge.s32.totalorder %v365_v48, 0  ;;  %vm376_vm13 = vcmp.ge.s32.totalorder %v375_v49, 0 }
  0x53   : > { %vm1203_vm8 = vmpackc.low %vm1535_vm7, %vm506_vm5  ;;  %v385_v59 = vadd.s32 4294967283, %v1775_v36  ;;  %vm544_vm15 = vcmp.lt.s32.totalorder %v542_v54, 16  ;;  %v395_v61 = vadd.s32 4294967284, %v1775_v36  ;;  %v562_v1 = vadd.s32 5, %v1775_v36 }
  0x54   : > { %vm1206_vm11 = vmpackc.low %vm534_vm10, %vm524_vm9  ;;  %vm554_vm0 = vcmp.lt.s32.totalorder %v552_v55, 16  ;;  %v572_v2 = vadd.s32 6, %v1775_v36  ;;  %v405_v10 = vadd.s32 4294967285, %v1775_v36  ;;  %v415_v12 = vadd.s32 4294967286, %v1775_v36 }
  0x55   : > { %vm1182_vm14 = vmpackc.low %vm376_vm13, %vm366_vm12  ;;  %vm386_vm3 = vcmp.ge.s32.totalorder %v385_v59, 0  ;;  %vm396_vm4 = vcmp.ge.s32.totalorder %v395_v61, 0  ;;  %v592_v17 = vadd.s32 8, %v1775_v36  ;;  %v642_v20 = vadd.s32 13, %v1775_v36 }
  0x56   : > { %vm1209_vm1 = vmpackc.low %vm554_vm0, %vm544_vm15  ;;  %vm406_vm10 = vcmp.ge.s32.totalorder %v405_v10, 0  ;;  %v662_v34 = vadd.s32 15, %v1775_v36  ;;  %v455_v43 = vadd.s32 4294967290, %v1775_v36  ;;  %v622_v48 = vadd.s32 11, %v1775_v36 }
  0x57   : > { %vm1185_vm5 = vmpackc.low %vm396_vm4, %vm386_vm3  ;;  %vm644_vm0 = vcmp.lt.s32.totalorder %v642_v20, 16  ;;  %vm710_vm3 = vcmp.ge.s32.totalorder %v1775_v36, 1 }
  0xbb   : > { %v1773_v35 = vpop.permute.xlu1 %726 }
  0xbc   : > { %v1777_v37 = vpop.permute.xlu0 %1384 }
 0x124   : > { %v1692_v13 = vpop.f32.mrb[0].mxu0 }
 0x125   : > { %503 = vrot.lane.b32.xlu1 %v1692_v13, %s1505_s12  ;;  %483 = vrot.lane.b32.xlu0 %v1692_v13, %s1506_s20  ;;  %v1275_v14 = vpop.f32.mrb[1].mxu0  ;;  %s1519_s20 = smov 10  }
 0x126   : > { %v306_v15 = vpop.f32.mrb[2].mxu0 }
 0x127   : > { %v1276_v16 = vpop.f32.mrb[3].mxu0 }
 0x128   : > { %v582_v16 = vadd.s32 7, %v1775_v36 }
 0x129   : > { %520 = vrot.lane.b32.xlu1 %v1692_v13, %s1504_s28  ;;  %493 = vrot.lane.b32.xlu0 %v1692_v13, %s1507_s22  ;;  %s1520_s22 = smov 115  }
 0x12a   : > { %vm584_vm13 = vcmp.lt.s32.totalorder %v582_v16, 16 }
 0x12d   : > { %363 = vrot.lane.b32.xlu1 %v1692_v13, %s1508_s23  ;;  %530 = vrot.lane.b32.xlu0 %v1692_v13, %s1509_s29  ;;  %s1521_s23 = smov 120   ;;  %s1522_s29 = smov 9  }
 0x131   : > { %540 = vrot.lane.b32.xlu1 %v1692_v13, %s1510_s6  ;;  %373 = vrot.lane.b32.xlu0 %v1692_v13, %s1511_s7  ;;  %s1523_s6 = smov 114   ;;  %s1524_s7 = smov 119  }
 0x135   : > { %383 = vrot.lane.b32.xlu1 %v1692_v13, %s1512_s8  ;;  %550 = vrot.lane.b32.xlu0 %v1692_v13, %s1513_s9  ;;  %s1525_s8 = smov 8   ;;  %s1526_s9 = smov 113  }
 0x139   : > { %560 = vrot.lane.b32.xlu1 %v1692_v13, %s1514_s5  ;;  %393 = vrot.lane.b32.xlu0 %v1692_v13, %s1515_s30  ;;  %s1527_s5 = smov 118   ;;  %s1528_s30 = smov 6  }
 0x13d   : > { %403 = vrot.lane.b32.xlu1 %v1692_v13, %s1516_s11  ;;  %570 = vrot.lane.b32.xlu0 %v1692_v13, %s1517_s13  ;;  %s1529_s11 = smov 7   ;;  %s1530_s13 = smov 117  }
 0x141   : > { %580 = vrot.lane.b32.xlu1 %v1692_v13, %s1518_s14  ;;  %413 = vrot.lane.b32.xlu0 %v1692_v13, %s1519_s20  ;;  %s1531_s14 = smov 116   ;;  %s1532_s20 = smov 5  }
 0x145   : > { %640 = vrot.lane.b32.xlu1 %v1692_v13, %s1520_s22  ;;  %590 = vrot.lane.b32.xlu0 %v1692_v13, %s1521_s23  ;;  %s1533_s22 = smov 4  }
 0x149   : > { %423 = vrot.lane.b32.xlu1 %v1692_v13, %s1522_s29  ;;  %650 = vrot.lane.b32.xlu0 %v1692_v13, %s1523_s6  ;;  %s1537_s6 = smov [#allocation7]  }
 0x14d   : > { %600 = vrot.lane.b32.xlu1 %v1692_v13, %s1524_s7  ;;  %433 = vrot.lane.b32.xlu0 %v1692_v13, %s1525_s8  ;;  %s1435_s7 = sshll.u32 %s1537_s6, 4  ;;  %s1436_s7 = int_to_ptr.vmem [resolvable:$false] %s1435_s7 }
 0x151   : > { %660 = vrot.lane.b32.xlu1 %v1692_v13, %s1526_s9  ;;  %610 = vrot.lane.b32.xlu0 %v1692_v13, %s1527_s5  ;;  %s1437_s9 = scalar_lea.vmem %s1436_s7, 1024 }
 0x155   : > { %453 = vrot.lane.b32.xlu1 %v1692_v13, %s1528_s30  ;;  %443 = vrot.lane.b32.xlu0 %v1692_v13, %s1529_s11 }
 0x159   : > { %620 = vrot.lane.b32.xlu1 %v1692_v13, %s1530_s13  ;;  %630 = vrot.lane.b32.xlu0 %v1692_v13, %s1531_s14  ;;  %s256_s13 = scalar_lea.vmem [#allocation7], %s1662_s10 }
 0x15a   : > { %s1071_s14 = sshll.u32 %s256_s13, 4  ;;  %s1850_s14 = int_to_ptr.vmem [resolvable:$true] %s1071_s14 }
 0x15b   : > { %s1431_s29 = scalar_lea.vmem %s1850_s14, 512  ;;  %p1438_p4 = scmp.lt.s32.totalorder %s1850_s14, %s1436_s7 }
 0x15c   : > { %p1432_p11 = scmp.ne.s32.totalorder %s1850_s14, %s1431_s29  ;;  %p1439_p7 = scmp.lt.s32.totalorder %s1437_s9, %s1431_s29 }
 0x15d   : > { %463 = vrot.lane.b32.xlu1 %v1692_v13, %s1532_s20  ;;  %473 = vrot.lane.b32.xlu0 %v1692_v13, %s1533_s22  ;;  %s1179_s20 = sshll.u32 %s1586_s19, 7  ;;  %s1859_s19 = scalar_lea.sflag [#allocation6], %s228_s25 }
 0x15e   : > { %s1855_s23 = scalar_lea.hbm %s1906_s4, %s1179_s20  ;;  %p1433_p0 = pnand %p1432_p11, %p1919_p12 }
 0x15f   : > { %p1440_p8 = por %p1439_p7, %p1438_p4 }
 0x160   : > { %p1434_p3 = pneg %p1433_p0 }
 0x161   : > { %1389 = vrot.lane.b32.xlu1 %v1388_v18, %s1504_s28  ;;  %715 = vrot.lane.b32.xlu0 %v1675_v7, %s1505_s12 }
 0x162   : > { %p1441_p9 = pnand %p1440_p8, %p1434_p3 }
 0x165   : > { %717 = vrot.lane.b32.xlu0 %v1679_v9, %s1505_s12  ;;  %732 = vrot.lane.b32.xlu1 %v1679_v9, %s1504_s28 }
 0x169   : > { %836 = vperm.xlu1 %1394, %v826_v21   ;;  %831 = vperm.xlu0 %1393, %v825_v22   ;;  %v652_v22 = vadd.s32 14, %v1775_v36 }
 0x16d   : > { %841 = vperm.xlu1 %1394, %v827_v23   ;;  %846 = vperm.xlu0 %1393, %v828_v24  }
 0x171   : > { %1003 = vperm.xlu1 %1394, %v1170_v25   ;;  %1008 = vperm.xlu0 %1393, %v1171_v26   ;;  %v425_v26 = vadd.s32 4294967287, %v1775_v36 }
 0x175   : > { %1013 = vperm.xlu1 %1394, %v1172_v27   ;;  %1018 = vperm.xlu0 %1393, %v1173_v28   ;;  %v435_v27 = vadd.s32 4294967288, %v1775_v36  ;;  %v1386_v28 = vunpack.i.l.bf16 %v1777_v37 }
 0x177   : > { %v721_v38 = vsel %vm710_vm3, %v1386_v28, -3.4028235e+38  ;;  %v1402_v28 = vld [vmem:[#allocation4 + $0x20] ss:$12 sps:$4 sm:$0xff]  }
 0x178   : > { %v740_v44 = vmax.f32 %v1671_v5, %v721_v38 }
 0x179   : > { %1032 = vperm.xlu1 %1394, %v1174_v29   ;;  %1037 = vperm.xlu0 %1393, %v1175_v30  }
 0x17d   : > { %1042 = vperm.xlu1 %1394, %v1176_v31   ;;  %1047 = vperm.xlu0 %1393, %v1177_v32   ;;  %v602_v31 = vadd.s32 9, %v1775_v36  ;;  %v612_v32 = vadd.s32 10, %v1775_v36 }
 0x197   : > { %v504_v41 = vpop.permute.xlu1 %503  ;;  %v484_v42 = vpop.permute.xlu0 %483 }
 0x198   : > { %v1204_v50 = vpack.c.bf16 %v1692_v13, %v504_v41  ;;  %v445_v41 = vadd.s32 4294967289, %v1775_v36 }
 0x19b   : > { %v521_v45 = vpop.permute.xlu1 %520  ;;  %v494_v46 = vpop.permute.xlu0 %493 }
 0x19c   : > { %v1201_v47 = vpack.c.bf16 %v494_v46, %v484_v42 }
 0x19e   : > { %1233 = vmatprep.subr.msk.bf16.mxu1 %vm1200_vm6, %v1201_v47  ;;  %vm564_vm6 = vcmp.lt.s32.totalorder %v562_v1, 16 }
 0x19f   : > { %v364_v51 = vpop.permute.xlu1 %363  ;;  %1234 = vmatpush3.bf16.msra.mxu1 %v1536_v52  ;;  %v531_v53 = vpop.permute.xlu0 %530 }
 0x1a0   : > { %1235 = vmatprep.subr.msk.bf16.mxu1 %vm1203_vm8, %v1204_v50  ;;  %v1207_v56 = vpack.c.bf16 %v531_v53, %v521_v45  ;;  %vm574_vm8 = vcmp.lt.s32.totalorder %v572_v2, 16  ;;  %v1395_v2 = vld [vmem:[#allocation4] ss:$12 sps:$4 sm:$0xff]  }
 0x1a1   : > { %vm1212_vm9 = vmpackc.low %vm574_vm8, %vm564_vm6  ;;  %vm436_vm6 = vcmp.ge.s32.totalorder %v435_v27, 0 }
 0x1a3   : > { %v541_v57 = vpop.permute.xlu1 %540  ;;  %1236 = vmatpush3.bf16.msra.mxu1 %v1536_v52  ;;  %v374_v58 = vpop.permute.xlu0 %373 }
 0x1a4   : > { %v1183_v60 = vpack.c.bf16 %v374_v58, %v364_v51  ;;  %1237 = vmatprep.subr.msk.bf16.mxu1 %vm1206_vm11, %v1207_v56  ;;  %vm416_vm11 = vcmp.ge.s32.totalorder %v415_v12, 0  ;;  %v632_v51 = vadd.s32 12, %v1775_v36  ;;  %v465_v56 = vadd.s32 4294967291, %v1775_v36 }
 0x1a5   : > { %vm1188_vm12 = vmpackc.low %vm416_vm11, %vm406_vm10  ;;  %vm614_vm10 = vcmp.lt.s32.totalorder %v612_v32, 16  ;;  %vm725_vm11 = vcmp.le.s32.totalorder %v1775_v36, 14 }
 0x1a6   : > { %v736_v45 = vsel %vm725_vm11, %v1773_v35, -3.4028235e+38 }
 0x1a7   : > { %v384_v62 = vpop.permute.xlu1 %383  ;;  %1238 = vmatpush3.bf16.msk.msra.mxu1 %vm1182_vm14, %v1183_v60  ;;  %v551_v63 = vpop.permute.xlu0 %550  ;;  %vm594_vm14 = vcmp.lt.s32.totalorder %v592_v17, 16  ;;  %v744_v53 = vmax.f32 %v740_v44, %v736_v45 }
 0x1a8   : > { %v1210_v0 = vpack.c.bf16 %v551_v63, %v541_v57  ;;  %vm1215_vm15 = vmpackc.low %vm594_vm14, %vm584_vm13  ;;  %v475_v57 = vadd.s32 4294967292, %v1775_v36 }
 0x1a9   : > { %v822_v58 = vpack.c.bf16 %v744_v53, %v1502_v4 }
 0x1aa   : > { %1239 = vmatprep.subr.msk.bf16.mxu1 %vm1209_vm1, %v1210_v0  ;;  %vm654_vm1 = vcmp.lt.s32.totalorder %v652_v22, 16 }
 0x1ab   : > { %v561_v3 = vpop.permute.xlu1 %560  ;;  %v394_v8 = vpop.permute.xlu0 %393  ;;  %vm1224_vm4 = vmpackc.low %vm654_vm1, %vm644_vm0  ;;  %vm456_vm0 = vcmp.ge.s32.totalorder %v455_v43, 0 }
 0x1ac   : > { %v1186_v11 = vpack.c.bf16 %v394_v8, %v384_v62  ;;  %v1387_v62 = vunpack.i.h.bf16 %v1777_v37 }
 0x1ae   : > { %1240 = vmatpush3.bf16.msk.msra.mxu1 %vm1185_vm5, %v1186_v11  ;;  %vm426_vm5 = vcmp.ge.s32.totalorder %v425_v26, 0 }
 0x1af   : > { %v404_v13 = vpop.permute.xlu1 %403  ;;  %v571_v14 = vpop.permute.xlu0 %570  ;;  %vm1191_vm8 = vmpackc.low %vm436_vm6, %vm426_vm5  ;;  %vm466_vm6 = vcmp.ge.s32.totalorder %v465_v56, 0 }
 0x1b0   : > { %v1213_v15 = vpack.c.bf16 %v571_v14, %v561_v3 }
 0x1b2   : > { %1241 = vmatprep.subr.msk.bf16.mxu1 %vm1212_vm9, %v1213_v15  ;;  %vm604_vm9 = vcmp.lt.s32.totalorder %v602_v31, 16 }
 0x1b3   : > { %v581_v18 = vpop.permute.xlu1 %580  ;;  %v414_v19 = vpop.permute.xlu0 %413  ;;  %vm1218_vm13 = vmpackc.low %vm614_vm10, %vm604_vm9  ;;  %vm886_vm10 = vcmask 1043456  }
 0x1b4   : > { %v1189_v21 = vpack.c.bf16 %v414_v19, %v404_v13 }
 0x1b6   : > { %1242 = vmatpush3.bf16.msk.msra.mxu1 %vm1188_vm12, %v1189_v21  ;;  %vm664_vm12 = vcmp.lt.s32.totalorder %v662_v34, 16 }
 0x1b7   : > { %v641_v23 = vpop.permute.xlu1 %640  ;;  %v591_v24 = vpop.permute.xlu0 %590  ;;  %vm1227_vm14 = vmpackc.low %vm1535_vm7, %vm664_vm12  ;;  %vm634_vm7 = vcmp.lt.s32.totalorder %v632_v51, 16 }
 0x1b8   : > { %v1216_v25 = vpack.c.bf16 %v591_v24, %v581_v18  ;;  %v1400_v24 = vld [vmem:[#allocation4 + $0x18] ss:$12 sps:$4 sm:$0xff]  }
 0x1ba   : > { %1243 = vmatprep.subr.msk.bf16.mxu1 %vm1215_vm15, %v1216_v25  ;;  %vm446_vm15 = vcmp.ge.s32.totalorder %v445_v41, 0 }
 0x1bb   : > { %v424_v29 = vpop.permute.xlu1 %423  ;;  %v651_v30 = vpop.permute.xlu0 %650  ;;  %vm1194_vm1 = vmpackc.low %vm456_vm0, %vm446_vm15 }
 0x1bc   : > { %v1225_v33 = vpack.c.bf16 %v651_v30, %v641_v23 }
 0x1be   : > { %1277 = vmatprep.subr.msk.bf16.mxu0 %vm1224_vm4, %v1225_v33 }
 0x1bf   : > { %v601_v39 = vpop.permute.xlu1 %600  ;;  %1278 = vmatpush3.bf16.msk.msra.mxu0 %vm1224_vm4, %v1225_v33  ;;  %v434_v40 = vpop.permute.xlu0 %433  ;;  %vm624_vm4 = vcmp.lt.s32.totalorder %v622_v48, 16 }
 0x1c0   : > { %v1192_v42 = vpack.c.bf16 %v434_v40, %v424_v29  ;;  %vm1221_vm5 = vmpackc.low %vm634_vm7, %vm624_vm4 }
 0x1c2   : > { %1244 = vmatpush3.bf16.msk.msra.mxu1 %vm1191_vm8, %v1192_v42  ;;  %vm476_vm8 = vcmp.ge.s32.totalorder %v475_v57, 0 }
 0x1c3   : > { %v661_v46 = vpop.permute.xlu1 %660  ;;  %v611_v47 = vpop.permute.xlu0 %610  ;;  %vm1197_vm9 = vmpackc.low %vm476_vm8, %vm466_vm6 }
 0x1c4   : > { %v1228_v49 = vpack.c.bf16 %v1502_v4, %v661_v46  ;;  %v1219_v50 = vpack.c.bf16 %v611_v47, %v601_v39  ;;  %v722_v4 = vsel %vm710_vm3, %v1387_v62, -3.4028235e+38 }
 0x1c5   : > { %v741_v37 = vmax.f32 %v1673_v6, %v722_v4 }
 0x1c6   : > { %1245 = vmatprep.subr.msk.bf16.mxu1 %vm1218_vm13, %v1219_v50  ;;  %1279 = vmatprep.subr.msk.bf16.mxu0 %vm1227_vm14, %v1228_v49 }
 0x1c7   : > { %v454_v54 = vpop.permute.xlu1 %453  ;;  %1280 = vmatpush3.bf16.msk.msra.mxu0 %vm1227_vm14, %v1228_v49  ;;  %v444_v55 = vpop.permute.xlu0 %443 }
 0x1c8   : > { %v1195_v35 = vpack.c.bf16 %v454_v54, %v444_v55  ;;  %1281 = vmatprep.subr.bf16.mxu0 %v1536_v52 }
 0x1ca   : > { %1246 = vmatpush3.bf16.msk.msra.mxu1 %vm1194_vm1, %v1195_v35 }
 0x1cb   : > { %v621_v59 = vpop.permute.xlu1 %620  ;;  %1282 = vmatpush3.bf16.msra.mxu0 %v1536_v52  ;;  %v631_v60 = vpop.permute.xlu0 %630  ;;  %v1398_v52 = vld [vmem:[#allocation4 + $0x1c] ss:$12 sps:$4 sm:$0xff]  }
 0x1cc   : > { %v1222_v61 = vpack.c.bf16 %v631_v60, %v621_v59  ;;  %1283 = vmatprep.subr.bf16.mxu0 %v822_v58 }
 0x1ce   : > { %1247 = vmatprep.subr.msk.bf16.mxu1 %vm1221_vm5, %v1222_v61 }
 0x1cf   : > { %v464_v63 = vpop.permute.xlu1 %463  ;;  %1284 = vmatpush3.bf16.msra.mxu0 %v822_v58  ;;  %v474_v0 = vpop.permute.xlu0 %473 }
 0x1d0   : > { %v1198_v1 = vpack.c.bf16 %v474_v0, %v464_v63 }
 0x1d2   : > { %1248 = vmatpush3.bf16.msk.msra.mxu1 %vm1197_vm9, %v1198_v1 }
 0x1d3   : > { %v1390_v3 = vpop.permute.xlu1 %1389  ;;  %v716_v8 = vpop.permute.xlu0 %715 }
 0x1d4   : > { %v1392_v10 = vunpack.i.h.bf16 %v1390_v3  ;;  %v1391_v11 = vunpack.i.l.bf16 %v1390_v3  ;;  %v723_v12 = vsel %vm710_vm3, %v716_v8, -3.4028235e+38 }
 0x1d5   : > { %v742_v13 = vmax.f32 %v1675_v7, %v723_v12  ;;  %923 = vmatmul.mubr.bf16.vlgmr.msra.gmra.mrb[0].mxu1 %v1395_v2 }
 0x1d6   : > { %v738_v14 = vsel %vm725_vm11, %v1392_v10, -3.4028235e+38  ;;  %v737_v15 = vsel %vm725_vm11, %v1391_v11, -3.4028235e+38  ;;  %930 = vmatprep.mubr.bf16.mxu1 %v1398_v52 }
 0x1d7   : > { %v745_v16 = vmax.f32 %v741_v37, %v737_v15  ;;  %v746_v17 = vmax.f32 %v742_v13, %v738_v14  ;;  %v718_v18 = vpop.permute.xlu0 %717  ;;  %v733_v19 = vpop.permute.xlu1 %732 }
 0x1d8   : > { %v724_v20 = vsel %vm710_vm3, %v718_v18, -3.4028235e+38  ;;  %v739_v21 = vsel %vm725_vm11, %v733_v19, -3.4028235e+38 }
 0x1d9   : > { %v743_v22 = vmax.f32 %v1679_v9, %v724_v20  ;;  %v823_v23 = vpack.c.bf16 %v746_v17, %v745_v16 }
 0x1db   : > { %v747_v25 = vmax.f32 %v743_v22, %v739_v21  ;;  %1285 = vmatprep.subr.bf16.mxu0 %v823_v23 }
 0x1dc   : > { %1286 = vmatpush3.bf16.msra.mxu0 %v823_v23 }
 0x1dd   : > { %v824_v26 = vpack.c.bf16 %v747_v25, %v747_v25  ;;  %931 = vmatmul.mubr.bf16.gmra.mrb[4].mxu1 %v1400_v24 }
 0x1df   : > { %1293 = vmatprep.subr.msk.bf16.mxu0 %vm886_vm10, %v824_v26  ;;  %v888_v27 = vsel %vm886_vm10, %v824_v26, 0 }
 0x1e0   : > { %1288 = vmatpush3.bf16.msra.mxu0 %v888_v27 }
 0x1e3   : > { %1290 = vmatmul.mubr.msk.bf16.vlgmr.msra.gmra.mrb[4].mxu0 %vm879_vm2, %v1402_v28 }
 0x1e8   : > { %v837_v29 = vpop.permute.xlu1 %836  ;;  %v832_v30 = vpop.permute.xlu0 %831 }
 0x1ec   : > { %v842_v36 = vpop.permute.xlu1 %841  ;;  %v847_v31 = vpop.permute.xlu0 %846 }
 0x1f0   : > { %v1004_v40 = vpop.permute.xlu1 %1003  ;;  %v1009_v42 = vpop.permute.xlu0 %1008 }
 0x1f4   : > { %v1014_v45 = vpop.permute.xlu1 %1013  ;;  %v1019_v49 = vpop.permute.xlu0 %1018 }
 0x1f8   : > { %v1033_v57 = vpop.permute.xlu1 %1032  ;;  %v1038_v0 = vpop.permute.xlu0 %1037 }
 0x1fc   : > { %v1043_v12 = vpop.permute.xlu1 %1042  ;;  %v1048_v16 = vpop.permute.xlu0 %1047 }
 0x2a8   : > { %v1249_v32 = vpop.f32.mrb[0].mxu1 }
 0x2a9   : > { %v1250_v33 = vpop.f32.mrb[1].mxu1 }
 0x2aa   : > { %v1251_v34 = vadd.f32 %v1250_v33, %v1249_v32  ;;  %v1252_v38 = vpop.f32.mrb[2].mxu1 }
 0x2ab   : > { %v1253_v39 = vpop.f32.mrb[3].mxu1 }
 0x2ac   : > { %v1254_v41 = vadd.f32 %v1253_v39, %v1252_v38  ;;  %v925_v54 = vadd.f32 %v1251_v34, %v832_v30 }
 0x2ae   : > { %v928_v60 = vadd.f32 %v1254_v41, %v837_v29 }
 0x2b0   : > { %v1255_v43 = vpop.f32.mrb[4].mxu1 }
 0x2b1   : > { %v1256_v44 = vpop.f32.mrb[5].mxu1 }
 0x2b2   : > { %v1257_v46 = vadd.f32 %v1256_v44, %v1255_v43  ;;  %v1258_v47 = vpop.f32.mrb[6].mxu1 }
 0x2b3   : > { %v1259_v48 = vpop.f32.mrb[7].mxu1 }
 0x2b4   : > { %v1260_v50 = vadd.f32 %v1259_v48, %v1258_v47  ;;  %v933_v51 = vadd.f32 %v1257_v46, %v842_v36 }
 0x2b6   : > { %v1291_v53 = vpop.f32.mrb[4].mxu0  ;;  %v936_v55 = vadd.f32 %v1260_v50, %v847_v31 }
 0x2b7   : > { %v982_v35 = vadd.f32 %v1291_v53, %v933_v51  ;;  %v973_v56 = vpop.f32.mrb[5].mxu0 }
 0x2b8   : > { %v974_v58 = vadd.f32 %v973_v56, %v925_v54  ;;  %v1292_v59 = vpop.f32.mrb[6].mxu0 }
 0x2b9   : > { %v990_v61 = vmax.f32 %v982_v35, 0.0  ;;  %v985_v62 = vadd.f32 %v1292_v59, %v936_v55  ;;  %v976_v63 = vpop.f32.mrb[7].mxu0 }
 0x2ba   : > { %v988_v1 = vmax.f32 %v974_v58, 0.0  ;;  %v977_v2 = vadd.f32 %v976_v63, %v928_v60 }
 0x2bb   : > { %v994_v4 = vadd.f32 %v990_v61, %v1675_v7  ;;  %v991_v52 = vmax.f32 %v985_v62, 0.0 }
 0x2bc   : > { %v992_v3 = vadd.f32 %v988_v1, %v1671_v5  ;;  %v989_v8 = vmax.f32 %v977_v2, 0.0 }
 0x2bd   : > { %v1023_v10 = vmul.f32 %v1014_v45, %v994_v4  ;;  %v995_v11 = vadd.f32 %v991_v52, %v1679_v9 }
 0x2be   : > { %v1021_v37 = vmul.f32 %v1004_v40, %v992_v3  ;;  %v993_v13 = vadd.f32 %v989_v8, %v1673_v6 }
 0x2bf   : > { %v1052_v14 = vadd.f32 %v1043_v12, %v1023_v10  ;;  %v1024_v15 = vmul.f32 %v1019_v49, %v995_v11 }
 0x2c0   : > { %v1050_v5 = vadd.f32 %v1033_v57, %v1021_v37  ;;  %v1022_v7 = vmul.f32 %v1009_v42, %v993_v13 }
 0x2c1   : > { %1056 = vst [vmem:[%s256_s13 + $0x10] sm:$0xff] %v1052_v14  ;;  %v1053_v17 = vadd.f32 %v1048_v16, %v1024_v15 }
 0x2c2   : > { %1054 = vst [vmem:[%s256_s13] sm:$0xff] %v1050_v5  ;;  %v1051_v6 = vadd.f32 %v1038_v0, %v1022_v7 }
 0x2c3   : > { %1057 = vst [vmem:[%s256_s13 + $0x18] sm:$0xff] %v1053_v17 }
 0x2c4   : > { %1055 = vst [vmem:[%s256_s13 + $0x8] sm:$0xff] %v1051_v6 }
 0x2c5   : > { %1444 = shalt.err (!%p1441_p9)
}
 0x2c6   : > { %s1445_s25 = scalar_lea.hbm %s1855_s23, 512  ;;  %s1449_s11 = scalar_lea.hbm %s1906_s4, 1024 }
 0x2c7   : > { %p1446_p13 = scmp.ne.s32.totalorder %s1855_s23, %s1445_s25  ;;  %p1450_p6 = scmp.lt.u32.totalorder %s1855_s23, %s1906_s4 }
 0x2c8   : > { %p1451_p10 = scmp.lt.u32.totalorder %s1449_s11, %s1445_s25  ;;  %p1453_p0 = scmp.lt.u32.totalorder %s1445_s25, %s1855_s23 }
 0x2c9   : > { %p1447_p2 = pnand %p1446_p13, %p1919_p12 }
 0x2ca   : > { %p1452_p11 = por %p1451_p10, %p1450_p6 }
 0x2cb   : > { %p1448_p5 = pneg %p1447_p2 }
 0x2cc   : > { %p1454_p3 = por %p1453_p0, %p1452_p11 }
 0x2ce   : > { %p1455_p4 = pnand %p1454_p3, %p1448_p5 }
 0x2d0   : > { %1458 = shalt.err (!%p1455_p4)
}
 0x2d1   : > { %s1538_s13 = smov 128   ;;  %s1539_s20 = smov 256  }
 0x2d2   : > { %1298 = dma.vmem_to_hbm [thread:$0]  (%p1919_p12), %s1850_s14, 512, %s1855_s23, %s1859_s19, %s1538_s13, %s1539_s20, %s1525_s8  }
 0x2d3 PF: > { %s1086_s10 = sand.u32 1, %s1485_s15   ;;  %p1920_p7 = scmp.ne.s32.totalorder %s1912_s27, 0 }
 0x2d4   : > { %s1087_s22 = scalar_lea.sflag [#allocation6], %s1086_s10 }
 0x2d5   : > { %p1305_p8 = pnand %p1154_p1, %p1920_p7 }
 0x2d7   : > { %1480 = dma.done.wait (!%p1305_p8), %s1087_s22, 512  }
 0x2d8   : > { %1482 = vsyncadd (!%p1305_p8), %s1087_s22, 4294966784  ;;  %p15_p9 = scmp.ge.s32.totalorder %s1590_s21, 4   ;;  %s1921_s15 = smov %s1489_s16 }
 0x2d9   : > { %s1922_s16 = smov %s1493_s17  ;;  %s1923_s17 = smov %s1602_s24 }
 0x2da   : > { %s1924_s18 = smov %s1590_s21  ;;  %17 = sbr.rel (!%p15_p9) target bundleno = 4 (0x4), region = 121 }
 0x2e1   :  { %1092 = vsyncpa [#allocation5], 1 }
 0x2e2   :  { %1094 = vsyncpa [#allocation5 + $0x1], 1 }
 0x2e3   :  { %1095 = vsyncpa [#allocation6], 1 }
 0x2e4   :  { %1097 = vsyncpa [#allocation6 + $0x1], 1 }

</bundles_post_ra>
